<compile_context>
chip_gen: v6e
topology: v6e:2x2x1
jax: 0.10.0
libtpu: 0.0.40
codegen_flags: <defaults>
</compile_context>

<pallas_src>
import functools

import jax
import jax.numpy as jnp
from jax import lax
from jax.experimental import pallas as pl
from jax.experimental.pallas import tpu as pltpu


def _sepconv_kernel(x_ref, h_ref, dw_ref, pw_ref, o_ref, *, th, Wo, C, mm_dtype):
    """One (batch element, row tile) step of the separable conv.

    x_ref : (th, 2, Wh, 2C)  row-pairs of the padded input; [r, s, w, p*C + c] =
                             x_padded[2*(row0 + r) + s, 2*w + p, c]
    h_ref : (1, 2, Wh, 2C)   the next row-pair (halo) for the kh == 2 taps
    dw_ref: (9, C)  fp32     depthwise weights, tap index = kh*3 + kw
    pw_ref: (C, C)  mm_dtype pointwise weights (Cin, Cout)
    o_ref : (th, Wo, C)
    """
    f32 = jnp.float32
    dw = dw_ref[...]                                   # (9, C) fp32
    pw = pw_ref[...]                                   # (C, C) mm_dtype

    def taps3(ref, rows, base):
        """The 3 horizontal taps of one kernel row (even input rows of `rows`)."""
        t0 = ref[rows, 0, 0:Wo, 0:C].astype(f32)           # kw = 0 (even col)
        t1 = ref[rows, 0, 0:Wo, C:2 * C].astype(f32)       # kw = 1 (odd col)
        t2 = ref[rows, 0, 1:Wo + 1, 0:C].astype(f32)       # kw = 2 (next even col)
        return t0 * dw[base] + t1 * dw[base + 1] + t2 * dw[base + 2]

    def taps3_odd(ref, rows, base):
        """Same, but for the odd input row of each pair (kh == 1)."""
        t0 = ref[rows, 1, 0:Wo, 0:C].astype(f32)
        t1 = ref[rows, 1, 0:Wo, C:2 * C].astype(f32)
        t2 = ref[rows, 1, 1:Wo + 1, 0:C].astype(f32)
        return t0 * dw[base] + t1 * dw[base + 1] + t2 * dw[base + 2]

    def pointwise(a, m):
        # (m, Wo, C) fp32 -> (m, Wo, C).  The (m, Wo) merge is a free relabel when
        # Wo % 8 == 0; otherwise a small in-VMEM relayout (kernel is HBM-bound).
        out = jnp.dot(a.reshape(m * Wo, C).astype(mm_dtype), pw,
                      preferred_element_type=f32)
        return out.reshape(m, Wo, C).astype(o_ref.dtype)

    all_rows = slice(0, th)
    # kh = 0 (even row of pair r) and kh = 1 (odd row of pair r).
    acc = taps3(x_ref, all_rows, 0) + taps3_odd(x_ref, all_rows, 3)   # (th, Wo, C)

    # kh = 2 reads the even row of the *next* row-pair: rows 0..th-2 take it from
    # this block, the last row takes it from the 1-pair halo block.
    if th > 1:
        top = acc[0:th - 1] + taps3(x_ref, slice(1, th), 6)
        o_ref[0:th - 1] = pointwise(top, th - 1)
    bot = acc[th - 1:th] + taps3(h_ref, slice(0, 1), 6)
    o_ref[th - 1:th] = pointwise(bot, 1)


def _pick_row_tile(N, Ho, Wo, C, in_it, out_it, mm_it, budget):
    """Largest row tile whose double-buffered blocks + temporaries fit `budget`."""
    Wh = Wo + 1
    per_row = (2 * (2 * Wh * 2 * C) * in_it        # main input block (double buffered)
               + 2 * Wo * C * out_it               # output block (double buffered)
               + 6 * Wo * C * 4)                   # fp32/bf16 in-kernel temporaries
    fixed = (2 * (2 * Wh * 2 * C) * in_it          # halo row-pair (double buffered)
             + 2 * C * C * mm_it + 2 * 9 * C * 4)  # weights (double buffered)
    th = (budget - fixed) // max(per_row, 1)
    th = int(max(1, min(Ho, th)))
    # Keep at least 2 grid steps so both v7x TensorCores see work.
    if N * pl.cdiv(Ho, th) < 2 and Ho > 1:
        th = pl.cdiv(Ho, 2)
    return th


def _downsample_nhwc(x, dw_w, pw_w, row_tile, mxu_bf16):
    N, H, W, C = x.shape
    Ho = (H - 1) // 2 + 1
    Wo = (W - 1) // 2 + 1
    Hh, Wh = Ho + 1, Wo + 1
    # The halo index_map below relies on this tie between padding and Hh/Wh.
    assert Hh == Ho + 1 and Wh == Wo + 1

    # ---- layout glue (single fused pass; the reshape is a free relabel) --------
    # conv padding = 1 on top/left; bottom/right padded so the padded extents are
    # exactly (2*Hh, 2*Wh) and the pixel-pair reshape is an exact row-major relabel.
    xp = jnp.pad(x, ((0, 0), (1, 2 * Hh - H - 1), (1, 2 * Wh - W - 1), (0, 0)))
    assert xp.shape == (N, 2 * Hh, 2 * Wh, C)
    x6 = xp.reshape(N, Hh, 2, Wh, 2 * C)            # free row-major relabel

    mm_dtype = jnp.bfloat16 if mxu_bf16 else jnp.float32
    dw_flat = dw_w.transpose(1, 2, 0).reshape(9, C).astype(jnp.float32)   # (tap, C)
    pw_mm = pw_w.astype(mm_dtype)                                         # (Cin, Cout)

    in_it = jnp.dtype(x.dtype).itemsize
    out_it = in_it
    mm_it = jnp.dtype(mm_dtype).itemsize

    # ---- generation-aware tiling ------------------------------------------------
    try:
        vmem_cap = int(getattr(pltpu.get_tpu_info(), "vmem_capacity_bytes",
                               64 * 1024 * 1024))
    except Exception:
        vmem_cap = 64 * 1024 * 1024
    vmem_limit = int(min((vmem_cap * 3) // 4, 96 * 1024 * 1024))
    budget = (vmem_limit * 3) // 4                   # headroom for compiler scratch

    if row_tile is None:
        th = _pick_row_tile(N, Ho, Wo, C, in_it, out_it, mm_it, budget)
    else:
        th = max(1, min(int(row_tile), Ho))
    n_tiles = pl.cdiv(Ho, th)                        # ragged last tile is fine

    main_map = lambda b, i: (b, i, 0, 0, 0)
    halo_map = lambda b, i: (b, jnp.minimum((i + 1) * th, Hh - 1), 0, 0, 0)
    const_map = lambda b, i: (0, 0)

    kernel = functools.partial(_sepconv_kernel, th=th, Wo=Wo, C=C, mm_dtype=mm_dtype)

    flops = 2 * N * Ho * Wo * C * (9 + C)
    bytes_accessed = int(N * (2 * Hh) * (2 * Wh) * C * in_it
                         + N * Ho * Wo * C * out_it
                         + 9 * C * 4 + C * C * mm_it)

    return pl.pallas_call(
        kernel,
        out_shape=jax.ShapeDtypeStruct((N, Ho, Wo, C), x.dtype),
        grid=(N, n_tiles),
        in_specs=[
            pl.BlockSpec((None, th, 2, Wh, 2 * C), main_map),     # row-pair tile
            pl.BlockSpec((None, 1, 2, Wh, 2 * C), halo_map),      # next row-pair
            pl.BlockSpec((9, C), const_map),                      # depthwise weights
            pl.BlockSpec((C, C), const_map),                      # pointwise weights
        ],
        out_specs=pl.BlockSpec((None, th, Wo, C), main_map[:0:-1] if False else
                               (lambda b, i: (b, i, 0, 0))),
        compiler_params=pltpu.CompilerParams(
            dimension_semantics=("parallel", "parallel"),
            vmem_limit_bytes=vmem_limit,
        ),
        cost_estimate=pl.CostEstimate(flops=flops, transcendentals=0,
                                      bytes_accessed=bytes_accessed),
    )(x6, x6, dw_flat, pw_mm)


@functools.partial(jax.jit, static_argnames=("row_tile", "mxu_bf16"))
def downsample_nhwc(x, dw_w, pw_w, *, row_tile=None, mxu_bf16=True):
    """Channels-last forward pass: x (N, H, W, C) -> (N, Ho, Wo, C)."""
    return _downsample_nhwc(x, dw_w, pw_w, row_tile, mxu_bf16)


@functools.partial(jax.jit, static_argnames=("row_tile", "mxu_bf16"))
def downsample(x_nchw, dw_w, pw_w, *, row_tile=None, mxu_bf16=True):
    """Forward pass of Downsample (SeparableConv2d, k=3, stride=2, pad=1, no bias).

    x_nchw: (N, C, H, W)  activations in PyTorch layout
    dw_w  : (C, 3, 3)     depthwise weights (PyTorch (C, 1, 3, 3) squeezed)
    pw_w  : (C, C)        pointwise weights as (Cin, Cout)
    mxu_bf16=True runs the 1x1 conv on the MXU in bf16 with fp32 accumulation
    (tolerance ~3e-2); set False for an fp32 matmul.
    returns (N, C, Ho, Wo)
    """
    # TODO(synk): these two transposes are full extra HBM passes -- keep the model
    # NHWC and call downsample_nhwc directly when possible.
    x = jnp.transpose(x_nchw, (0, 2, 3, 1))
    y = _downsample_nhwc(x, dw_w, pw_w, row_tile, mxu_bf16)
    return jnp.transpose(y, (0, 3, 1, 2))


def ref_downsample(x_nchw, dw_w, pw_w):
    """Pure-JAX reference matching PyTorch SeparableConv2d(k=3, s=2, p=1, no bias)."""
    N, C, H, W = x_nchw.shape
    x = jnp.transpose(x_nchw, (0, 2, 3, 1))
    rhs = dw_w.transpose(1, 2, 0).reshape(3, 3, 1, C)              # HWIO, depthwise
    dwo = lax.conv_general_dilated(
        x, rhs, window_strides=(2, 2), padding=((1, 1), (1, 1)),
        dimension_numbers=("NHWC", "HWIO", "NHWC"), feature_group_count=C)
    out = jnp.einsum("nhwc,cd->nhwd", dwo, pw_w)
    return jnp.transpose(out, (0, 3, 1, 2))


if __name__ == "__main__":
    key = jax.random.PRNGKey(0)
    k1, k2, k3 = jax.random.split(key, 3)

    # Lane-dense example: C = 128 fills the 128-lane axis (2C = 256 in-kernel).
    N, C, H, W = 2, 128, 32, 32
    x = jax.random.normal(k1, (N, C, H, W), jnp.float32)
    dw_w = jax.random.normal(k2, (C, 3, 3), jnp.float32) * 0.1     # depthwise (C,1,3,3) squeezed
    pw_w = jax.random.normal(k3, (C, C), jnp.float32) * 0.1        # pointwise (Cin, Cout)

    ref = ref_downsample(x, dw_w, pw_w)

    # Auto-tiled, bf16-MXU path.
    out = jax.block_until_ready(downsample(x, dw_w, pw_w))
    assert out.shape == (N, C, H // 2, W // 2), out.shape
    assert jnp.allclose(out, ref, atol=3e-2, rtol=3e-2), float(jnp.max(jnp.abs(out - ref)))

    # Ragged row tiles (Ho=16, row_tile=5 -> tiles 5,5,5,1): halo clamp + masked tail.
    out_r = jax.block_until_ready(downsample(x, dw_w, pw_w, row_tile=5))
    assert jnp.allclose(out_r, ref, atol=3e-2, rtol=3e-2), float(jnp.max(jnp.abs(out_r - ref)))

    # fp32-MXU path, tighter tolerance.
    out_f = jax.block_until_ready(downsample(x, dw_w, pw_w, row_tile=8, mxu_bf16=False))
    assert jnp.allclose(out_f, ref, atol=1e-3, rtol=1e-3), float(jnp.max(jnp.abs(out_f - ref)))

    # Odd spatial size: exercises the extra bottom/right pad and auto ragged tiling.
    x2 = jax.random.normal(k1, (1, 64, 17, 17), jnp.float32)
    dw2 = jax.random.normal(k2, (64, 3, 3), jnp.float32) * 0.1
    pw2 = jax.random.normal(k3, (64, 64), jnp.float32) * 0.1
    ref2 = ref_downsample(x2, dw2, pw2)
    out2 = jax.block_until_ready(downsample(x2, dw2, pw2, mxu_bf16=False))
    assert out2.shape == (1, 64, 9, 9), out2.shape
    assert jnp.allclose(out2, ref2, atol=1e-3, rtol=1e-3), float(jnp.max(jnp.abs(out2 - ref2)))

    print("KERNEL_OK")
</pallas_src>

<mosaic_0001>
module attributes {stable_mosaic.version = 11 : i64} {
  func.func @_sepconv_kernel(%arg0: i32, %arg1: i32, %arg2: memref<1x16x2x17x256xf32, #tpu.memory_space<vmem>>, %arg3: memref<1x1x2x17x256xf32, #tpu.memory_space<vmem>>, %arg4: memref<9x128xf32, #tpu.memory_space<vmem>>, %arg5: memref<128x128xbf16, #tpu.memory_space<vmem>>, %arg6: memref<1x16x16x128xf32, #tpu.memory_space<vmem>>) attributes {dimension_semantics = [#tpu.dimension_semantics<parallel>, #tpu.dimension_semantics<parallel>], iteration_bounds = array<i64: 2, 1>, scalar_prefetch = 0 : i64, scratch_operands = 0 : i64, tpu.core_type = #tpu.core_type<tc>, window_params = [{transform_indices = @transform_0, window_bounds = array<i64: 1, 16, 2, 17, 256>}, {transform_indices = @transform_1, window_bounds = array<i64: 1, 1, 2, 17, 256>}, {pipeline_mode = #tpu.pipeline_mode<synchronous>, transform_indices = @transform_2, window_bounds = array<i64: 9, 128>}, {pipeline_mode = #tpu.pipeline_mode<synchronous>, transform_indices = @transform_3, window_bounds = array<i64: 128, 128>}, {transform_indices = @transform_4, window_bounds = array<i64: 1, 16, 16, 128>}]} {
    %c0 = arith.constant 0 : index
    %c0_0 = arith.constant 0 : index
    %0 = vector.load %arg4[%c0, %c0_0] : memref<9x128xf32, #tpu.memory_space<vmem>>, vector<9x128xf32>
    %c0_1 = arith.constant 0 : index
    %c0_2 = arith.constant 0 : index
    %1 = vector.load %arg5[%c0_1, %c0_2] : memref<128x128xbf16, #tpu.memory_space<vmem>>, vector<128x128xbf16>
    %c0_3 = arith.constant 0 : index
    %c0_4 = arith.constant 0 : index
    %c0_5 = arith.constant 0 : index
    %c0_6 = arith.constant 0 : index
    %c0_7 = arith.constant 0 : index
    %2 = vector.load %arg2[%c0_3, %c0_4, %c0_5, %c0_6, %c0_7] : memref<1x16x2x17x256xf32, #tpu.memory_space<vmem>>, vector<1x16x1x16x128xf32>
    %3 = vector.shape_cast %2 : vector<1x16x1x16x128xf32> to vector<16x16x128xf32>
    %c0_8 = arith.constant 0 : index
    %c0_9 = arith.constant 0 : index
    %c0_10 = arith.constant 0 : index
    %c0_11 = arith.constant 0 : index
    %c128 = arith.constant 128 : index
    %4 = vector.load %arg2[%c0_8, %c0_9, %c0_10, %c0_11, %c128] : memref<1x16x2x17x256xf32, #tpu.memory_space<vmem>>, vector<1x16x1x16x128xf32>
    %5 = vector.shape_cast %4 : vector<1x16x1x16x128xf32> to vector<16x16x128xf32>
    %c0_12 = arith.constant 0 : index
    %c0_13 = arith.constant 0 : index
    %c0_14 = arith.constant 0 : index
    %c1 = arith.constant 1 : index
    %c0_15 = arith.constant 0 : index
    %6 = vector.load %arg2[%c0_12, %c0_13, %c0_14, %c1, %c0_15] : memref<1x16x2x17x256xf32, #tpu.memory_space<vmem>>, vector<1x16x1x16x128xf32>
    %7 = vector.shape_cast %6 : vector<1x16x1x16x128xf32> to vector<16x16x128xf32>
    %8 = vector.extract_strided_slice %0 {offsets = [0, 0], sizes = [1, 128], strides = [1, 1]} : vector<9x128xf32> to vector<1x128xf32>
    %9 = vector.shape_cast %8 : vector<1x128xf32> to vector<128xf32>
    %10 = vector.shape_cast %9 : vector<128xf32> to vector<1x1x128xf32>
    %11 = vector.broadcast %10 : vector<1x1x128xf32> to vector<16x16x128xf32>
    %12 = arith.mulf %3, %11 : vector<16x16x128xf32>
    %13 = vector.extract_strided_slice %0 {offsets = [1, 0], sizes = [1, 128], strides = [1, 1]} : vector<9x128xf32> to vector<1x128xf32>
    %14 = vector.shape_cast %13 : vector<1x128xf32> to vector<128xf32>
    %15 = vector.shape_cast %14 : vector<128xf32> to vector<1x1x128xf32>
    %16 = vector.broadcast %15 : vector<1x1x128xf32> to vector<16x16x128xf32>
    %17 = arith.mulf %5, %16 : vector<16x16x128xf32>
    %18 = arith.addf %12, %17 : vector<16x16x128xf32>
    %19 = vector.extract_strided_slice %0 {offsets = [2, 0], sizes = [1, 128], strides = [1, 1]} : vector<9x128xf32> to vector<1x128xf32>
    %20 = vector.shape_cast %19 : vector<1x128xf32> to vector<128xf32>
    %21 = vector.shape_cast %20 : vector<128xf32> to vector<1x1x128xf32>
    %22 = vector.broadcast %21 : vector<1x1x128xf32> to vector<16x16x128xf32>
    %23 = arith.mulf %7, %22 : vector<16x16x128xf32>
    %24 = arith.addf %18, %23 : vector<16x16x128xf32>
    %c0_16 = arith.constant 0 : index
    %c0_17 = arith.constant 0 : index
    %c1_18 = arith.constant 1 : index
    %c0_19 = arith.constant 0 : index
    %c0_20 = arith.constant 0 : index
    %25 = vector.load %arg2[%c0_16, %c0_17, %c1_18, %c0_19, %c0_20] : memref<1x16x2x17x256xf32, #tpu.memory_space<vmem>>, vector<1x16x1x16x128xf32>
    %26 = vector.shape_cast %25 : vector<1x16x1x16x128xf32> to vector<16x16x128xf32>
    %c0_21 = arith.constant 0 : index
    %c0_22 = arith.constant 0 : index
    %c1_23 = arith.constant 1 : index
    %c0_24 = arith.constant 0 : index
    %c128_25 = arith.constant 128 : index
    %27 = vector.load %arg2[%c0_21, %c0_22, %c1_23, %c0_24, %c128_25] : memref<1x16x2x17x256xf32, #tpu.memory_space<vmem>>, vector<1x16x1x16x128xf32>
    %28 = vector.shape_cast %27 : vector<1x16x1x16x128xf32> to vector<16x16x128xf32>
    %c0_26 = arith.constant 0 : index
    %c0_27 = arith.constant 0 : index
    %c1_28 = arith.constant 1 : index
    %c1_29 = arith.constant 1 : index
    %c0_30 = arith.constant 0 : index
    %29 = vector.load %arg2[%c0_26, %c0_27, %c1_28, %c1_29, %c0_30] : memref<1x16x2x17x256xf32, #tpu.memory_space<vmem>>, vector<1x16x1x16x128xf32>
    %30 = vector.shape_cast %29 : vector<1x16x1x16x128xf32> to vector<16x16x128xf32>
    %31 = vector.extract_strided_slice %0 {offsets = [3, 0], sizes = [1, 128], strides = [1, 1]} : vector<9x128xf32> to vector<1x128xf32>
    %32 = vector.shape_cast %31 : vector<1x128xf32> to vector<128xf32>
    %33 = vector.shape_cast %32 : vector<128xf32> to vector<1x1x128xf32>
    %34 = vector.broadcast %33 : vector<1x1x128xf32> to vector<16x16x128xf32>
    %35 = arith.mulf %26, %34 : vector<16x16x128xf32>
    %36 = vector.extract_strided_slice %0 {offsets = [4, 0], sizes = [1, 128], strides = [1, 1]} : vector<9x128xf32> to vector<1x128xf32>
    %37 = vector.shape_cast %36 : vector<1x128xf32> to vector<128xf32>
    %38 = vector.shape_cast %37 : vector<128xf32> to vector<1x1x128xf32>
    %39 = vector.broadcast %38 : vector<1x1x128xf32> to vector<16x16x128xf32>
    %40 = arith.mulf %28, %39 : vector<16x16x128xf32>
    %41 = arith.addf %35, %40 : vector<16x16x128xf32>
    %42 = vector.extract_strided_slice %0 {offsets = [5, 0], sizes = [1, 128], strides = [1, 1]} : vector<9x128xf32> to vector<1x128xf32>
    %43 = vector.shape_cast %42 : vector<1x128xf32> to vector<128xf32>
    %44 = vector.shape_cast %43 : vector<128xf32> to vector<1x1x128xf32>
    %45 = vector.broadcast %44 : vector<1x1x128xf32> to vector<16x16x128xf32>
    %46 = arith.mulf %30, %45 : vector<16x16x128xf32>
    %47 = arith.addf %41, %46 : vector<16x16x128xf32>
    %48 = arith.addf %24, %47 : vector<16x16x128xf32>
    %49 = vector.extract_strided_slice %48 {offsets = [0, 0, 0], sizes = [15, 16, 128], strides = [1, 1, 1]} : vector<16x16x128xf32> to vector<15x16x128xf32>
    %c0_31 = arith.constant 0 : index
    %c1_32 = arith.constant 1 : index
    %c0_33 = arith.constant 0 : index
    %c0_34 = arith.constant 0 : index
    %c0_35 = arith.constant 0 : index
    %50 = vector.load %arg2[%c0_31, %c1_32, %c0_33, %c0_34, %c0_35] : memref<1x16x2x17x256xf32, #tpu.memory_space<vmem>>, vector<1x15x1x16x128xf32>
    %51 = vector.shape_cast %50 : vector<1x15x1x16x128xf32> to vector<15x16x128xf32>
    %c0_36 = arith.constant 0 : index
    %c1_37 = arith.constant 1 : index
    %c0_38 = arith.constant 0 : index
    %c0_39 = arith.constant 0 : index
    %c128_40 = arith.constant 128 : index
    %52 = vector.load %arg2[%c0_36, %c1_37, %c0_38, %c0_39, %c128_40] : memref<1x16x2x17x256xf32, #tpu.memory_space<vmem>>, vector<1x15x1x16x128xf32>
    %53 = vector.shape_cast %52 : vector<1x15x1x16x128xf32> to vector<15x16x128xf32>
    %c0_41 = arith.constant 0 : index
    %c1_42 = arith.constant 1 : index
    %c0_43 = arith.constant 0 : index
    %c1_44 = arith.constant 1 : index
    %c0_45 = arith.constant 0 : index
    %54 = vector.load %arg2[%c0_41, %c1_42, %c0_43, %c1_44, %c0_45] : memref<1x16x2x17x256xf32, #tpu.memory_space<vmem>>, vector<1x15x1x16x128xf32>
    %55 = vector.shape_cast %54 : vector<1x15x1x16x128xf32> to vector<15x16x128xf32>
    %56 = vector.extract_strided_slice %0 {offsets = [6, 0], sizes = [1, 128], strides = [1, 1]} : vector<9x128xf32> to vector<1x128xf32>
    %57 = vector.shape_cast %56 : vector<1x128xf32> to vector<128xf32>
    %58 = vector.shape_cast %57 : vector<128xf32> to vector<1x1x128xf32>
    %59 = vector.broadcast %58 : vector<1x1x128xf32> to vector<15x16x128xf32>
    %60 = arith.mulf %51, %59 : vector<15x16x128xf32>
    %61 = vector.extract_strided_slice %0 {offsets = [7, 0], sizes = [1, 128], strides = [1, 1]} : vector<9x128xf32> to vector<1x128xf32>
    %62 = vector.shape_cast %61 : vector<1x128xf32> to vector<128xf32>
    %63 = vector.shape_cast %62 : vector<128xf32> to vector<1x1x128xf32>
    %64 = vector.broadcast %63 : vector<1x1x128xf32> to vector<15x16x128xf32>
    %65 = arith.mulf %53, %64 : vector<15x16x128xf32>
    %66 = arith.addf %60, %65 : vector<15x16x128xf32>
    %67 = vector.extract_strided_slice %0 {offsets = [8, 0], sizes = [1, 128], strides = [1, 1]} : vector<9x128xf32> to vector<1x128xf32>
    %68 = vector.shape_cast %67 : vector<1x128xf32> to vector<128xf32>
    %69 = vector.shape_cast %68 : vector<128xf32> to vector<1x1x128xf32>
    %70 = vector.broadcast %69 : vector<1x1x128xf32> to vector<15x16x128xf32>
    %71 = arith.mulf %55, %70 : vector<15x16x128xf32>
    %72 = arith.addf %66, %71 : vector<15x16x128xf32>
    %73 = arith.addf %49, %72 : vector<15x16x128xf32>
    %74 = vector.shape_cast %73 : vector<15x16x128xf32> to vector<240x128xf32>
    %75 = arith.truncf %74 : vector<240x128xf32> to vector<240x128xbf16>
    %cst = arith.constant dense<0.000000e+00> : vector<240x128xf32>
    %76 = tpu.matmul %75, %1, %cst {dimension_numbers = #tpu.dot_dimension_numbers<[1], [0], [0], [1], [0, 0, 1, 1], [], []>} : vector<240x128xbf16>, vector<128x128xbf16>, vector<240x128xf32> -> vector<240x128xf32>
    %77 = vector.shape_cast %76 : vector<240x128xf32> to vector<15x16x128xf32>
    %c0_46 = arith.constant 0 : index
    %c0_47 = arith.constant 0 : index
    %c0_48 = arith.constant 0 : index
    %c0_49 = arith.constant 0 : index
    %78 = vector.load %arg6[%c0_46, %c0_47, %c0_48, %c0_49] : memref<1x16x16x128xf32, #tpu.memory_space<vmem>>, vector<1x15x16x128xf32>
    %79 = vector.shape_cast %78 : vector<1x15x16x128xf32> to vector<15x16x128xf32>
    %80 = vector.shape_cast %77 : vector<15x16x128xf32> to vector<1x15x16x128xf32>
    tpu.vector_store %arg6[%c0_46, %c0_47, %c0_48, %c0_49], %80 {strides = array<i32>} : memref<1x16x16x128xf32, #tpu.memory_space<vmem>>, vector<1x15x16x128xf32>,
    %81 = vector.extract_strided_slice %48 {offsets = [15, 0, 0], sizes = [1, 16, 128], strides = [1, 1, 1]} : vector<16x16x128xf32> to vector<1x16x128xf32>
    %c0_50 = arith.constant 0 : index
    %c0_51 = arith.constant 0 : index
    %c0_52 = arith.constant 0 : index
    %c0_53 = arith.constant 0 : index
    %c0_54 = arith.constant 0 : index
    %82 = vector.load %arg3[%c0_50, %c0_51, %c0_52, %c0_53, %c0_54] : memref<1x1x2x17x256xf32, #tpu.memory_space<vmem>>, vector<1x1x1x16x128xf32>
    %83 = vector.shape_cast %82 : vector<1x1x1x16x128xf32> to vector<1x16x128xf32>
    %c0_55 = arith.constant 0 : index
    %c0_56 = arith.constant 0 : index
    %c0_57 = arith.constant 0 : index
    %c0_58 = arith.constant 0 : index
    %c128_59 = arith.constant 128 : index
    %84 = vector.load %arg3[%c0_55, %c0_56, %c0_57, %c0_58, %c128_59] : memref<1x1x2x17x256xf32, #tpu.memory_space<vmem>>, vector<1x1x1x16x128xf32>
    %85 = vector.shape_cast %84 : vector<1x1x1x16x128xf32> to vector<1x16x128xf32>
    %c0_60 = arith.constant 0 : index
    %c0_61 = arith.constant 0 : index
    %c0_62 = arith.constant 0 : index
    %c1_63 = arith.constant 1 : index
    %c0_64 = arith.constant 0 : index
    %86 = vector.load %arg3[%c0_60, %c0_61, %c0_62, %c1_63, %c0_64] : memref<1x1x2x17x256xf32, #tpu.memory_space<vmem>>, vector<1x1x1x16x128xf32>
    %87 = vector.shape_cast %86 : vector<1x1x1x16x128xf32> to vector<1x16x128xf32>
    %88 = vector.extract_strided_slice %0 {offsets = [6, 0], sizes = [1, 128], strides = [1, 1]} : vector<9x128xf32> to vector<1x128xf32>
    %89 = vector.shape_cast %88 : vector<1x128xf32> to vector<128xf32>
    %90 = vector.shape_cast %89 : vector<128xf32> to vector<1x1x128xf32>
    %91 = vector.broadcast %90 : vector<1x1x128xf32> to vector<1x16x128xf32>
    %92 = arith.mulf %83, %91 : vector<1x16x128xf32>
    %93 = vector.extract_strided_slice %0 {offsets = [7, 0], sizes = [1, 128], strides = [1, 1]} : vector<9x128xf32> to vector<1x128xf32>
    %94 = vector.shape_cast %93 : vector<1x128xf32> to vector<128xf32>
    %95 = vector.shape_cast %94 : vector<128xf32> to vector<1x1x128xf32>
    %96 = vector.broadcast %95 : vector<1x1x128xf32> to vector<1x16x128xf32>
    %97 = arith.mulf %85, %96 : vector<1x16x128xf32>
    %98 = arith.addf %92, %97 : vector<1x16x128xf32>
    %99 = vector.extract_strided_slice %0 {offsets = [8, 0], sizes = [1, 128], strides = [1, 1]} : vector<9x128xf32> to vector<1x128xf32>
    %100 = vector.shape_cast %99 : vector<1x128xf32> to vector<128xf32>
    %101 = vector.shape_cast %100 : vector<128xf32> to vector<1x1x128xf32>
    %102 = vector.broadcast %101 : vector<1x1x128xf32> to vector<1x16x128xf32>
    %103 = arith.mulf %87, %102 : vector<1x16x128xf32>
    %104 = arith.addf %98, %103 : vector<1x16x128xf32>
    %105 = arith.addf %81, %104 : vector<1x16x128xf32>
    %106 = vector.shape_cast %105 : vector<1x16x128xf32> to vector<16x128xf32>
    %107 = arith.truncf %106 : vector<16x128xf32> to vector<16x128xbf16>
    %cst_65 = arith.constant dense<0.000000e+00> : vector<16x128xf32>
    %108 = tpu.matmul %107, %1, %cst_65 {dimension_numbers = #tpu.dot_dimension_numbers<[1], [0], [0], [1], [0, 0, 1, 1], [], []>} : vector<16x128xbf16>, vector<128x128xbf16>, vector<16x128xf32> -> vector<16x128xf32>
    %109 = vector.shape_cast %108 : vector<16x128xf32> to vector<1x16x128xf32>
    %c0_66 = arith.constant 0 : index
    %c15 = arith.constant 15 : index
    %c0_67 = arith.constant 0 : index
    %c0_68 = arith.constant 0 : index
    %110 = vector.load %arg6[%c0_66, %c15, %c0_67, %c0_68] : memref<1x16x16x128xf32, #tpu.memory_space<vmem>>, vector<1x1x16x128xf32>
    %111 = vector.shape_cast %110 : vector<1x1x16x128xf32> to vector<1x16x128xf32>
    %112 = vector.shape_cast %109 : vector<1x16x128xf32> to vector<1x1x16x128xf32>
    tpu.vector_store %arg6[%c0_66, %c15, %c0_67, %c0_68], %112 {strides = array<i32>} : memref<1x16x16x128xf32, #tpu.memory_space<vmem>>, vector<1x1x16x128xf32>,
    return
  }
  func.func @transform_0(%arg0: i32, %arg1: i32) -> (i32, i32, i32, i32, i32) {
    %c0_i32 = arith.constant 0 : i32
    %c0_i32_0 = arith.constant 0 : i32
    %c0_i32_1 = arith.constant 0 : i32
    %c0_i32_2 = arith.constant 0 : i32
    return %arg0, %arg1, %c0_i32, %c0_i32_0, %c0_i32_1 : i32, i32, i32, i32, i32
  }
  func.func @transform_1(%arg0: i32, %arg1: i32) -> (i32, i32, i32, i32, i32) {
    %c1_i32 = arith.constant 1 : i32
    %0 = arith.addi %arg1, %c1_i32 : i32
    %c16_i32 = arith.constant 16 : i32
    %1 = arith.muli %0, %c16_i32 : i32
    %c16_i32_0 = arith.constant 16 : i32
    %2 = arith.minsi %1, %c16_i32_0 : i32
    %c0_i32 = arith.constant 0 : i32
    %c0_i32_1 = arith.constant 0 : i32
    %c0_i32_2 = arith.constant 0 : i32
    %c0_i32_3 = arith.constant 0 : i32
    return %arg0, %2, %c0_i32, %c0_i32_1, %c0_i32_2 : i32, i32, i32, i32, i32
  }
  func.func @transform_2(%arg0: i32, %arg1: i32) -> (i32, i32) {
    %c0_i32 = arith.constant 0 : i32
    %c0_i32_0 = arith.constant 0 : i32
    %c0_i32_1 = arith.constant 0 : i32
    return %c0_i32, %c0_i32_0 : i32, i32
  }
  func.func @transform_3(%arg0: i32, %arg1: i32) -> (i32, i32) {
    %c0_i32 = arith.constant 0 : i32
    %c0_i32_0 = arith.constant 0 : i32
    %c0_i32_1 = arith.constant 0 : i32
    return %c0_i32, %c0_i32_0 : i32, i32
  }
  func.func @transform_4(%arg0: i32, %arg1: i32) -> (i32, i32, i32, i32) {
    %c0_i32 = arith.constant 0 : i32
    %c0_i32_0 = arith.constant 0 : i32
    %c0_i32_1 = arith.constant 0 : i32
    return %arg0, %arg1, %c0_i32, %c0_i32_0 : i32, i32, i32, i32
  }
}

</mosaic_0001>

<bundles_post_ra>
// kernel: downsample.1
= control target key start
LH: loop header
LB: loop body
LE: loop exit
PB: predicated region body
PF: predicated region fallthrough
CT: control target
= control target key end

     0   :  { %9 = vsyncpa [#allocation3], 0  ;;  %s3935_s0 = inlined_call_operand.vmem [shape: f32[2,17,2,17,256], index: 0, kind: input, shape index: {}, may-alias: {0,1}]   ;;  %s3936_s1 = inlined_call_operand.vmem [shape: f32[2,17,2,17,256], index: 1, kind: input, shape index: {}, may-alias: {0,1}]   ;;  %s3937_s2 = inlined_call_operand.vmem [shape: f32[9,128], index: 2, kind: input, shape index: {}]   ;;  %s3938_s3 = inlined_call_operand.vmem [shape: bf16[128,128], index: 3, kind: input, shape index: {}]   ;;  %s3939_s4 = inlined_call_operand.hbm [shape: f32[2,16,16,128], index: 4, kind: output, shape index: {}]  }
   0x1   :  { %11 = vsyncpa [#allocation3 + $0x1], 0  ;;  %s2693_s15 = smov 0   ;;  %s2695_s16 = smov 0  }
   0x2   :  { %s2697_s17 = smov 0   ;;  %s2699_s18 = smov 0  }
   0x3   :  { %s2701_s19 = smov 0   ;;  %s2703_s20 = smov 0  }
   0x4 LB: > { %s2156_s21 = sadd.s32 4294967295, %s2661_s20   ;;  %s2157_s22 = sadd.s32 4294967294, %s2661_s20   ;;  %s2661_s20 = sphi %s2703_s20, %s17_s20   ;;  %s2657_s19 = sphi %s2701_s19, %s3946_s19   ;;  %s2653_s18 = sphi %s2699_s18, %s3945_s18   ;;  %s2649_s17 = sphi %s2697_s17, %s3944_s17   ;;  %s2645_s16 = sphi %s2695_s16, %s3943_s16   ;;  %s2641_s15 = sphi %s2693_s15, %s3942_s15  }
   0x5   : > { %s29_s23 = sadd.s32 1, %s2657_s19  ;;  %s144_s24 = sadd.s32 1, %s2649_s17 }
   0x6   : > { %p31_p0 = scmp.ge.s32.totalorder %s29_s23, 2  ;;  %p154_p1 = scmp.ne.s32.totalorder %s2649_s17, %s2645_s16 }
   0x7   : > { %p155_p2 = scmp.eq.s32.totalorder %s2156_s21, 1  ;;  %p160_p3 = scmp.ne.s32.totalorder %s2645_s16, %s2641_s15 }
   0x8   : > { %s3948_s23 = smov (%p31_p0, %s29_s23), 0  ;;  %p161_p5 = scmp.eq.s32.totalorder %s2157_s22, 1 }
   0x9   : > { %p2733_p4 = por %p155_p2, %p154_p1  ;;  %s139_s26 = ssub.s32 %s2657_s19, %s3948_s23 }
   0xa   : > { %p2160_p6 = scmp.ge.s32.totalorder %s2661_s20, 1  ;;  %p142_p7 = scmp.eq.s32.totalorder %s139_s26, 0 }
   0xb   : > { %p2740_p8 = por %p161_p5, %p160_p3  ;;  %p233_p9 = scmp.lt.s32.totalorder %s2661_s20, 3 }
   0xc   : > { %s2746_s28 = scalar_select %p142_p7, %s2649_s17, %s144_s24  }
   0xd   : > { %p234_p10 = pnand %p2160_p6, %p233_p9 }
   0xe   : > { %p292_p11 = scmp.lt.s32.totalorder (!%p234_p10), %s2653_s18, 1  ;;  %s2368_s8 = sshll.u32 (!%p234_p10), %s2653_s18, 12 }
   0xf   : > { %237 = sbr.rel (%p234_p10) target bundleno = 461 (0x1cd), region = 36  ;;  %s3883_s13 = scalar_lea.hbm (!%p234_p10), %s3939_s4, %s2368_s8 }
  0x10   : > { %s2665_s22 = smov (!%p234_p10), [#allocation2]  }
  0x14   : > { %v2751_v0 = vld [vmem:[%s3938_s3 + $0x38] sm:$0xff]   ;;  %v442_v1 = vlaneseq  ;;  %v2663_v2 = vmov 0.0   ;;  %v2760_v3 = vld [vmem:[%s3938_s3 + $0x30] sm:$0xff]   ;;  %vm2664_vm0 = vmmov 0   ;;  %s2772_s7 = scalar_select %p292_p11, %s2653_s18, 1  ;;  %v2780_v6 = vld [vmem:[%s3938_s3 + $0x28] sm:$0xff]  }
  0x15   : > { %2401 = vmatprep.subr.bf16.mxu0 %v2663_v2  ;;  %2497 = vmatprep.subr.bf16.mxu1 %v2663_v2  ;;  %v2788_v7 = vld [vmem:[%s3938_s3 + $0x20] sm:$0xff]   ;;  %vm646_vm1 = vcmask 1046528   ;;  %v2838_v36 = vld [vmem:[%s3937_s2 + $0x8] ss:$0 sm:$0xff]  ;;  %v2850_v41 = vld [vmem:[%s3938_s3 + $0x18] sm:$0xff]  }
  0x16   : > { %2402 = vmatpush3.bf16.msra.mxu0 %v2751_v0  ;;  %2505 = vmatpush3.bf16.msra.mxu1 %v2751_v0  ;;  %v2765_v4 = vshrl.u32 %v442_v1, 7  ;;  %s2513_s10 = smul.u32 1632, %s2772_s7  ;;  %v328_v8 = vld [vmem:[%s3937_s2] sm:$0xff] }
  0x17   : > { %2403 = vmatprep.subr.bf16.mxu0 %v2663_v2  ;;  %2498 = vmatprep.subr.bf16.mxu1 %v2663_v2 }
  0x18   : > { %2417 = vmatprep.mubr.msk.bf16.mxu0 %vm2664_vm0, %v2663_v2  ;;  %2449 = vmatprep.mubr.msk.bf16.mxu1 %vm2664_vm0, %v2663_v2  ;;  %v444_v5 = vsub.s32 0, %v2765_v4  ;;  %s2795_s21 = scalar_lea.vmem %s3935_s0, %s2513_s10  ;;  %v480_v9 = vsub.s32 1, %v2765_v4  ;;  %v548_v10 = vsub.s32 2, %v2765_v4  ;;  %v890_v15 = vsub.s32 3, %v2765_v4  ;;  %s2367_s24 = sadd.s32 1536, %s2513_s10 }
  0x19   : > { %v346_v11 = vld [vmem:[%s2795_s21] sm:$0xff]  ;;  %v347_v12 = vld [vmem:[%s2795_s21 + $0x10] sm:$0xff]  ;;  %v378_v13 = vld [vmem:[%s2795_s21 + $0x8] sm:$0xff]  ;;  %v926_v16 = vsub.s32 4, %v2765_v4  ;;  %v994_v17 = vsub.s32 5, %v2765_v4  ;;  %v1361_v23 = vsub.s32 6, %v2765_v4  ;;  %s3806_s26 = scalar_lea.vmem %s3936_s1, %s2367_s24 }
  0x1a   : > { %2404 = vmatpush3.bf16.msra.mxu0 %v2760_v3  ;;  %2506 = vmatpush3.bf16.msra.mxu1 %v2760_v3  ;;  %v2805_v14 = vrot.slane %v328_v8, %v444_v5  ;;  %v379_v18 = vld [vmem:[%s2795_s21 + $0x18] sm:$0xff]  ;;  %v410_v19 = vld [vmem:[%s2795_s21] sm:$0xfe]  ;;  %v411_v20 = vld [vmem:[%s2795_s21 + $0x20] sm:$0x1]  ;;  %v2815_v21 = vrot.slane %v328_v8, %v480_v9  ;;  %v2817_v22 = vrot.slane %v328_v8, %v548_v10  ;;  %v1395_v29 = vsub.s32 7, %v2765_v4 }
  0x1b   : > { %2405 = vmatprep.subr.bf16.mxu0 %v2663_v2  ;;  %2499 = vmatprep.subr.bf16.mxu1 %v2663_v2  ;;  %v2164_v26 = vld [vmem:[%s2795_s21 + $0x30] sm:$0xff]  ;;  %v2165_v27 = vld [vmem:[%s2795_s21 + $0x40] sm:$0xff]  ;;  %v2826_v28 = vrot.slane %v328_v8, %v890_v15  ;;  %v2196_v34 = vld [vmem:[%s2795_s21 + $0x38] sm:$0xff]  ;;  %v2843_v40 = vrot.slane %v328_v8, %v926_v16  ;;  %v2858_v51 = vrot.slane %v328_v8, %v994_v17  ;;  %s2589_s24 = sshll.u32 %s2665_s22, 4  ;;  %s2590_s24 = int_to_ptr.vmem [resolvable:$false] %s2589_s24 }
  0x1c   : > { %v446_v24 = vmul.f32 %v2805_v14, %v346_v11  ;;  %v447_v25 = vmul.f32 %v2805_v14, %v347_v12  ;;  %v482_v30 = vmul.f32 %v2815_v21, %v378_v13  ;;  %v483_v31 = vmul.f32 %v2815_v21, %v379_v18  ;;  %v2197_v35 = vld [vmem:[%s2795_s21 + $0x48] sm:$0xff]  ;;  %v2320_v46 = vld [vmem:[%s2795_s21 + $0x60] sm:$0xfe]  ;;  %v2228_v48 = vld [vmem:[%s2795_s21 + $0x30] sm:$0xfe]  ;;  %s2591_s7 = scalar_lea.vmem %s2590_s24, 8192 }
  0x1d   : > { %v550_v32 = vmul.f32 %v2817_v22, %v410_v19  ;;  %v551_v33 = vmul.f32 %v2817_v22, %v347_v12  ;;  %v552_v37 = vmul.f32 %v2817_v22, %v411_v20  ;;  %v892_v38 = vmul.f32 %v2164_v26, %v2826_v28  ;;  %v2229_v53 = vld [vmem:[%s2795_s21 + $0x50] sm:$0x1]  ;;  %v2863_v54 = vld [vmem:[%s2795_s21 + $0x60] sm:$0xff]  ;;  %v2875_v63 = vld [vmem:[%s2795_s21 + $0x68] sm:$0xff] }
  0x1e   : > { %2406 = vmatpush3.bf16.msra.mxu0 %v2780_v6  ;;  %2507 = vmatpush3.bf16.msra.mxu1 %v2780_v6  ;;  %v893_v39 = vmul.f32 %v2165_v27, %v2826_v28  ;;  %v514_v42 = vadd.f32 %v482_v30, %v446_v24  ;;  %v515_v43 = vadd.f32 %v483_v31, %v447_v25  ;;  %v2866_v55 = vld [vmem:[%s2795_s21 + $0x70] sm:$0xff]  ;;  %v2878_v1 = vld [vmem:[%s2795_s21 + $0x78] sm:$0xff]  ;;  %v2321_v10 = vld [vmem:[%s2795_s21 + $0x80] sm:$0x1] }
  0x1f   : > { %2407 = vmatprep.subr.bf16.mxu0 %v2663_v2  ;;  %2500 = vmatprep.subr.bf16.mxu1 %v2663_v2  ;;  %v647_v44 = vrot.slane %v550_v32, 1  ;;  %v648_v45 = vrot.slane %v551_v33, 1  ;;  %v650_v47 = vrot.slane %v552_v37, 1  ;;  %v928_v49 = vmul.f32 %v2196_v34, %v2843_v40  ;;  %v2885_v4 = vld [vmem:[%s3938_s3 + $0x10] sm:$0xff]   ;;  %v362_v11 = vld [vmem:[%s2795_s21 + $0x300] sm:$0xff]  ;;  %v2914_v31 = vld [vmem:[%s3938_s3 + $0x8] sm:$0xff]  }
  0x20   : > { %v929_v50 = vmul.f32 %v2197_v35, %v2843_v40  ;;  %v2868_v56 = vrot.slane %v328_v8, %v1361_v23  ;;  %v2870_v57 = vrot.slane %v328_v8, %v1395_v29  ;;  %v1461_v58 = vmul.f32 %v2838_v36, %v2320_v46  ;;  %v363_v26 = vld [vmem:[%s2795_s21 + $0x310] sm:$0xff]  ;;  %v395_v29 = vld [vmem:[%s2795_s21 + $0x318] sm:$0xff]  ;;  %v426_v35 = vld [vmem:[%s2795_s21 + $0x300] sm:$0xfe] }
  0x21   : > { %v649_v52 = vsel %vm646_vm1, %v647_v44, %v648_v45  ;;  %v651_v59 = vsel %vm646_vm1, %v648_v45, %v650_v47  ;;  %v960_v61 = vadd.f32 %v928_v49, %v892_v38  ;;  %v996_v8 = vmul.f32 %v2228_v48, %v2858_v51  ;;  %v2927_v47 = vld [vmem:[%s3938_s3] sm:$0xff]  }
  0x22   : > { %2408 = vmatpush3.bf16.msra.mxu0 %v2788_v7  ;;  %2508 = vmatpush3.bf16.msra.mxu1 %v2788_v7  ;;  %v759_v60 = vadd.f32 %v649_v52, %v514_v42  ;;  %v961_v62 = vadd.f32 %v929_v50, %v893_v39  ;;  %v760_v5 = vadd.f32 %v651_v59, %v515_v43  ;;  %v1551_v16 = vrot.slane %v1461_v58, 1  ;;  %v427_v52 = vld [vmem:[%s2795_s21 + $0x320] sm:$0x1]  ;;  %v2180_v58 = vld [vmem:[%s2795_s21 + $0x330] sm:$0xff] }
  0x23   : > { %2409 = vmatprep.subr.bf16.mxu0 %v2663_v2  ;;  %2501 = vmatprep.subr.bf16.mxu1 %v2663_v2  ;;  %v997_v9 = vmul.f32 %v2165_v27, %v2858_v51  ;;  %v998_v12 = vmul.f32 %v2229_v53, %v2858_v51  ;;  %v1363_v13 = vmul.f32 %v2863_v54, %v2868_v56  ;;  %v1092_v17 = vrot.slane %v996_v8, 1  ;;  %v394_v27 = vld [vmem:[%s2795_s21 + $0x308] sm:$0xff]  ;;  %v2181_v8 = vld [vmem:[%s2795_s21 + $0x340] sm:$0xff] }
  0x24   : > { %v1364_v15 = vmul.f32 %v2866_v55, %v2868_v56  ;;  %v1397_v19 = vmul.f32 %v2875_v63, %v2870_v57  ;;  %v1398_v20 = vmul.f32 %v2878_v1, %v2870_v57  ;;  %v1462_v24 = vmul.f32 %v2838_v36, %v2866_v55 }
  0x25   : > { %v1093_v18 = vrot.slane %v997_v9, 1  ;;  %v1095_v23 = vrot.slane %v998_v12, 1  ;;  %v1463_v25 = vmul.f32 %v2838_v36, %v2321_v10  ;;  %v462_v30 = vmul.f32 %v2805_v14, %v362_v11  ;;  %v2212_v9 = vld [vmem:[%s2795_s21 + $0x338] sm:$0xff] }
  0x26   : > { %2410 = vmatpush3.bf16.msra.mxu0 %v2850_v41  ;;  %2509 = vmatpush3.bf16.msra.mxu1 %v2850_v41  ;;  %v1427_v33 = vadd.f32 %v1397_v19, %v1363_v13  ;;  %v1428_v34 = vadd.f32 %v1398_v20, %v1364_v15  ;;  %v1552_v39 = vrot.slane %v1462_v24, 1  ;;  %v463_v44 = vmul.f32 %v2805_v14, %v363_v26  ;;  %v2244_v15 = vld [vmem:[%s2795_s21 + $0x330] sm:$0xfe] }
  0x27   : > { %2411 = vmatprep.subr.bf16.mxu0 %v2663_v2  ;;  %2502 = vmatprep.subr.bf16.mxu1 %v2663_v2  ;;  %v1094_v32 = vsel %vm646_vm1, %v1092_v17, %v1093_v18  ;;  %v1096_v37 = vsel %vm646_vm1, %v1093_v18, %v1095_v23  ;;  %v1554_v42 = vrot.slane %v1463_v25, 1  ;;  %v498_v45 = vmul.f32 %v2815_v21, %v394_v27  ;;  %v2245_v18 = vld [vmem:[%s2795_s21 + $0x350] sm:$0x1] }
  0x28   : > { %v1204_v38 = vadd.f32 %v1094_v32, %v960_v61  ;;  %v1205_v43 = vadd.f32 %v1096_v37, %v961_v62  ;;  %v499_v46 = vmul.f32 %v2815_v21, %v395_v29  ;;  %v1553_v49 = vsel %vm646_vm1, %v1551_v16, %v1552_v39  ;;  %v2954_v32 = vld [vmem:[%s2795_s21 + $0x360] sm:$0xff] }
  0x29   : > { %v1555_v50 = vsel %vm646_vm1, %v1552_v39, %v1554_v42  ;;  %v574_v53 = vmul.f32 %v2817_v22, %v426_v35  ;;  %v1656_v61 = vadd.f32 %v1553_v49, %v1427_v33  ;;  %v530_v10 = vadd.f32 %v498_v45, %v462_v30  ;;  %v2957_v33 = vld [vmem:[%s2795_s21 + $0x370] sm:$0xff]  ;;  %v2962_v39 = vld [vmem:[%s2795_s21 + $0x368] sm:$0xff]  ;;  %v2965_v42 = vld [vmem:[%s2795_s21 + $0x378] sm:$0xff] }
  0x2a   : > { %2412 = vmatpush3.bf16.msra.mxu0 %v2885_v4  ;;  %2510 = vmatpush3.bf16.msra.mxu1 %v2885_v4  ;;  %v1236_v48 = vadd.f32 %v1204_v38, %v759_v60  ;;  %v1237_v59 = vadd.f32 %v1205_v43, %v760_v5  ;;  %v1657_v62 = vadd.f32 %v1555_v50, %v1428_v34  ;;  %v2213_v60 = vld [vmem:[%s2795_s21 + $0x348] sm:$0xff]  ;;  %v2336_v43 = vld [vmem:[%s2795_s21 + $0x360] sm:$0xfe]  ;;  %v2337_v49 = vld [vmem:[%s2795_s21 + $0x380] sm:$0x1] }
  0x2b   : > { %2413 = vmatprep.subr.bf16.mxu0 %v2663_v2  ;;  %2503 = vmatprep.subr.bf16.mxu1 %v2663_v2  ;;  %v531_v11 = vadd.f32 %v499_v46, %v463_v44  ;;  %v575_v12 = vmul.f32 %v2817_v22, %v363_v26  ;;  %v687_v13 = vrot.slane %v574_v53, 1  ;;  %v576_v17 = vmul.f32 %v2817_v22, %v427_v52 }
  0x2c   : > { %v1686_v16 = vadd.f32 %v1656_v61, %v1236_v48  ;;  %v1687_v5 = vadd.f32 %v1657_v62, %v1237_v59  ;;  %v908_v19 = vmul.f32 %v2180_v58, %v2826_v28  ;;  %v909_v23 = vmul.f32 %v2181_v8, %v2826_v28 }
  0x2d   : > { %v688_v20 = vrot.slane %v575_v12, 1  ;;  %v944_v24 = vmul.f32 %v2212_v9, %v2843_v40  ;;  %v945_v25 = vmul.f32 %v2213_v60, %v2843_v40  ;;  %v690_v27 = vrot.slane %v576_v17, 1 }
  0x2e   : > { %2414 = vmatpush3.bf16.msra.mxu0 %v2914_v31  ;;  %2511 = vmatpush3.bf16.msra.mxu1 %v2914_v31  ;;  %v1716_v26 = vpack.c.bf16 %v1687_v5, %v1686_v16  ;;  %v1020_v29 = vmul.f32 %v2244_v15, %v2858_v51  ;;  %v1021_v30 = vmul.f32 %v2181_v8, %v2858_v51  ;;  %v412_v5 = vld [vmem:[%s2795_s21 + $0x60] sm:$0xfe] }
  0x2f   : > { %2415 = vmatprep.subr.bf16.mxu0 %v2663_v2  ;;  %2504 = vmatprep.subr.bf16.mxu1 %v2663_v2  ;;  %v689_v34 = vsel %vm646_vm1, %v687_v13, %v688_v20  ;;  %v976_v35 = vadd.f32 %v944_v24, %v908_v19  ;;  %v977_v37 = vadd.f32 %v945_v25, %v909_v23  ;;  %v413_v24 = vld [vmem:[%s2795_s21 + $0x80] sm:$0x1] }
  0x30   : > { %v1022_v38 = vmul.f32 %v2245_v18, %v2858_v51  ;;  %v691_v44 = vsel %vm646_vm1, %v688_v20, %v690_v27  ;;  %v775_v45 = vadd.f32 %v689_v34, %v530_v10  ;;  %v1132_v46 = vrot.slane %v1020_v29, 1  ;;  %v2166_v29 = vld [vmem:[%s2795_s21 + $0x90] sm:$0xff] }
  0x31   : > { %v1133_v48 = vrot.slane %v1021_v30, 1  ;;  %v776_v50 = vadd.f32 %v691_v44, %v531_v11  ;;  %v1379_v53 = vmul.f32 %v2954_v32, %v2868_v56  ;;  %v1380_v58 = vmul.f32 %v2957_v33, %v2868_v56 }
  0x32   : > { %2416 = vmatpush3.bf16.msra.mxu0 %v2927_v47  ;;  %2512 = vmatpush3.bf16.msra.mxu1 %v2927_v47  ;;  %v1135_v52 = vrot.slane %v1022_v38, 1  ;;  %v1413_v61 = vmul.f32 %v2962_v39, %v2870_v57  ;;  %v1414_v62 = vmul.f32 %v2965_v42, %v2870_v57  ;;  %v1485_v8 = vmul.f32 %v2838_v36, %v2336_v43  ;;  %v2198_v38 = vld [vmem:[%s2795_s21 + $0x98] sm:$0xff] }
  0x33   : > { %2477 = vmatprep.subr.bf16.mxu1 %v2663_v2  ;;  %v1134_v59 = vsel %vm646_vm1, %v1132_v46, %v1133_v48  ;;  %v1486_v10 = vmul.f32 %v2838_v36, %v2957_v33  ;;  %v1487_v11 = vmul.f32 %v2838_v36, %v2337_v49  ;;  %v448_v20 = vmul.f32 %v2863_v54, %v2805_v14  ;;  %v2199_v46 = vld [vmem:[%s2795_s21 + $0xa8] sm:$0xff] }
  0x34   : > { %v1136_v9 = vsel %vm646_vm1, %v1133_v48, %v1135_v52  ;;  %v1220_v60 = vadd.f32 %v1134_v59, %v976_v35  ;;  %v1443_v13 = vadd.f32 %v1413_v61, %v1379_v53  ;;  %v1444_v15 = vadd.f32 %v1414_v62, %v1380_v58  ;;  %v2231_v58 = vld [vmem:[%s2795_s21 + $0xb0] sm:$0x1] }
  0x35   : > { %2418 = vmatmul.mubr.bf16.vlgmr.msra.gmra.mxu0 %v1716_v26  ;;  %v1221_v12 = vadd.f32 %v1136_v9, %v977_v37  ;;  %v1591_v16 = vrot.slane %v1485_v8, 1  ;;  %v1592_v18 = vrot.slane %v1486_v10, 1  ;;  %v1594_v19 = vrot.slane %v1487_v11, 1  ;;  %v2167_v37 = vld [vmem:[%s2795_s21 + $0xa0] sm:$0xff]  ;;  %v3019_v11 = vld [vmem:[%s2795_s21 + $0xd0] sm:$0xff] }
  0x36   : > { %2421 = vmatprep.mubr.msk.bf16.mxu0 %vm2664_vm0, %v2663_v2  ;;  %v1252_v17 = vadd.f32 %v1220_v60, %v775_v45  ;;  %v449_v25 = vmul.f32 %v2866_v55, %v2805_v14  ;;  %v484_v26 = vmul.f32 %v2875_v63, %v2815_v21  ;;  %v485_v27 = vmul.f32 %v2878_v1, %v2815_v21  ;;  %v2230_v1 = vld [vmem:[%s2795_s21 + $0x90] sm:$0xfe]  ;;  %v3016_v10 = vld [vmem:[%s2795_s21 + $0xc0] sm:$0xff] }
  0x37   : > { %v1253_v23 = vadd.f32 %v1221_v12, %v776_v50  ;;  %v1593_v30 = vsel %vm646_vm1, %v1591_v16, %v1592_v18  ;;  %v1595_v34 = vsel %vm646_vm1, %v1592_v18, %v1594_v19  ;;  %v553_v54 = vmul.f32 %v2817_v22, %v412_v5  ;;  %v3023_v5 = vld [vmem:[%s2795_s21 + $0xc8] sm:$0xff]  ;;  %v2322_v18 = vld [vmem:[%s2795_s21 + $0xc0] sm:$0xfe] }
  0x38   : > { %v554_v35 = vmul.f32 %v2866_v55, %v2817_v22  ;;  %v1672_v43 = vadd.f32 %v1593_v30, %v1443_v13  ;;  %v1673_v44 = vadd.f32 %v1595_v34, %v1444_v15  ;;  %v516_v45 = vadd.f32 %v484_v26, %v448_v20 }
  0x39   : > { %v517_v63 = vadd.f32 %v485_v27, %v449_v25  ;;  %v555_v48 = vmul.f32 %v2817_v22, %v413_v24  ;;  %v652_v49 = vrot.slane %v553_v54, 1  ;;  %v894_v52 = vmul.f32 %v2166_v29, %v2826_v28  ;;  %v2323_v25 = vld [vmem:[%s2795_s21 + $0xe0] sm:$0x1] }
  0x3a   : > { %v653_v50 = vrot.slane %v554_v35, 1  ;;  %v1702_v53 = vadd.f32 %v1672_v43, %v1252_v17  ;;  %v1703_v55 = vadd.f32 %v1673_v44, %v1253_v23  ;;  %v895_v59 = vmul.f32 %v2167_v37, %v2826_v28  ;;  %v3026_v17 = vld [vmem:[%s2795_s21 + $0xd8] sm:$0xff] }
  0x3b   : > { %v930_v61 = vmul.f32 %v2198_v38, %v2843_v40  ;;  %v655_v8 = vrot.slane %v555_v48, 1  ;;  %v931_v9 = vmul.f32 %v2199_v46, %v2843_v40  ;;  %v999_v60 = vmul.f32 %v2230_v1, %v2858_v51  ;;  %v428_v48 = vld [vmem:[%s2795_s21 + $0x360] sm:$0xfe] }
  0x3c   : > { %v654_v62 = vsel %vm646_vm1, %v652_v49, %v653_v50  ;;  %v1724_v12 = vpack.c.bf16 %v1703_v55, %v1702_v53  ;;  %v1000_v16 = vmul.f32 %v2167_v37, %v2858_v51  ;;  %v1001_v23 = vmul.f32 %v2231_v58, %v2858_v51  ;;  %v429_v58 = vld [vmem:[%s2795_s21 + $0x380] sm:$0x1] }
  0x3d   : > { %v761_v13 = vadd.f32 %v654_v62, %v516_v45  ;;  %v962_v15 = vadd.f32 %v930_v61, %v894_v52  ;;  %v656_v19 = vsel %vm646_vm1, %v653_v50, %v655_v8  ;;  %v963_v20 = vadd.f32 %v931_v9, %v895_v59  ;;  %v2182_v62 = vld [vmem:[%s2795_s21 + $0x390] sm:$0xff] }
  0x3e   : > { %v1097_v24 = vrot.slane %v999_v60, 1  ;;  %2450 = vmatmul.mubr.bf16.vlgmr.msra.gmra.mxu1 %v1724_v12  ;;  %v762_v26 = vadd.f32 %v656_v19, %v517_v63  ;;  %v1098_v27 = vrot.slane %v1000_v16, 1  ;;  %v1365_v29 = vmul.f32 %v3016_v10, %v2868_v56 }
  0x3f   : > { %v1366_v30 = vmul.f32 %v3019_v11, %v2868_v56  ;;  %2478 = vmatpush3.bf16.msra.mxu1 %v2751_v0  ;;  %2453 = vmatprep.mubr.msk.bf16.mxu1 %vm2664_vm0, %v2663_v2  ;;  %v1100_v34 = vrot.slane %v1001_v23, 1  ;;  %v1399_v54 = vmul.f32 %v3023_v5, %v2870_v57  ;;  %v1400_v35 = vmul.f32 %v3026_v17, %v2870_v57 }
  0x40   : > { %v1464_v37 = vmul.f32 %v2838_v36, %v2322_v18  ;;  %2479 = vmatprep.subr.bf16.mxu1 %v2663_v2  ;;  %v1099_v38 = vsel %vm646_vm1, %v1097_v24, %v1098_v27  ;;  %v1465_v0 = vmul.f32 %v2838_v36, %v3019_v11  ;;  %v1466_v43 = vmul.f32 %v2838_v36, %v2323_v25  ;;  %v2247_v25 = vld [vmem:[%s2795_s21 + $0x3b0] sm:$0x1] }
  0x41   : > { %v464_v44 = vmul.f32 %v2954_v32, %v2805_v14  ;;  %v1101_v45 = vsel %vm646_vm1, %v1098_v27, %v1100_v34  ;;  %v1206_v63 = vadd.f32 %v1099_v38, %v962_v15  ;;  %v1429_v46 = vadd.f32 %v1399_v54, %v1365_v29  ;;  %v2214_v15 = vld [vmem:[%s2795_s21 + $0x398] sm:$0xff]  ;;  %v3081_v38 = vld [vmem:[%s2795_s21 + $0x3c0] sm:$0xff] }
  0x42   : > { %v1430_v1 = vadd.f32 %v1400_v35, %v1366_v30  ;;  %v1207_v49 = vadd.f32 %v1101_v45, %v963_v20  ;;  %v1556_v50 = vrot.slane %v1464_v37, 1  ;;  %v1557_v52 = vrot.slane %v1465_v0, 1  ;;  %v2246_v20 = vld [vmem:[%s2795_s21 + $0x390] sm:$0xfe] }
  0x43   : > { %v1559_v53 = vrot.slane %v1466_v43, 1  ;;  %v1238_v55 = vadd.f32 %v1206_v63, %v761_v13  ;;  %v465_v59 = vmul.f32 %v2957_v33, %v2805_v14  ;;  %v500_v32 = vmul.f32 %v2962_v39, %v2815_v21  ;;  %2480 = vmatpush3.bf16.msra.mxu1 %v2760_v3  ;;  %v2183_v13 = vld [vmem:[%s2795_s21 + $0x3a0] sm:$0xff]  ;;  %v3087_v63 = vld [vmem:[%s2795_s21 + $0x3d0] sm:$0xff] }
  0x44   : > { %v501_v61 = vmul.f32 %v2965_v42, %v2815_v21  ;;  %v1239_v8 = vadd.f32 %v1207_v49, %v762_v26  ;;  %v1558_v9 = vsel %vm646_vm1, %v1556_v50, %v1557_v52  ;;  %v577_v12 = vmul.f32 %v2817_v22, %v428_v48  ;;  %2481 = vmatprep.subr.bf16.mxu1 %v2663_v2  ;;  %v2215_v42 = vld [vmem:[%s2795_s21 + $0x3a8] sm:$0xff] }
  0x45   : > { %v1560_v60 = vsel %vm646_vm1, %v1557_v52, %v1559_v53  ;;  %v1658_v39 = vadd.f32 %v1558_v9, %v1429_v46  ;;  %v532_v18 = vadd.f32 %v500_v32, %v464_v44  ;;  %v578_v3 = vmul.f32 %v2957_v33, %v2817_v22  ;;  %v3093_v46 = vld [vmem:[%s2795_s21 + $0x3d8] sm:$0xff]  ;;  %v2338_v52 = vld [vmem:[%s2795_s21 + $0x3c0] sm:$0xfe]  ;;  %v2339_v32 = vld [vmem:[%s2795_s21 + $0x3e0] sm:$0x1] }
  0x46   : > { %v1659_v16 = vadd.f32 %v1560_v60, %v1430_v1  ;;  %v533_v19 = vadd.f32 %v501_v61, %v465_v59  ;;  %v579_v23 = vmul.f32 %v2817_v22, %v429_v58  ;;  %v692_v24 = vrot.slane %v577_v12, 1 }
  0x47   : > { %v910_v26 = vmul.f32 %v2182_v62, %v2826_v28  ;;  %v1688_v27 = vadd.f32 %v1658_v39, %v1238_v55  ;;  %v911_v30 = vmul.f32 %v2183_v13, %v2826_v28  ;;  %v946_v34 = vmul.f32 %v2214_v15, %v2843_v40  ;;  %2482 = vmatpush3.bf16.msra.mxu1 %v2780_v6  ;;  %v3090_v6 = vld [vmem:[%s2795_s21 + $0x3c8] sm:$0xff] }
  0x48   : > { %v1689_v29 = vadd.f32 %v1659_v16, %v1239_v8  ;;  %v693_v54 = vrot.slane %v578_v3, 1  ;;  %v695_v35 = vrot.slane %v579_v23, 1  ;;  %v947_v33 = vmul.f32 %v2215_v42, %v2843_v40  ;;  %2483 = vmatprep.subr.bf16.mxu1 %v2663_v2  ;;  %v415_v23 = vld [vmem:[%s2795_s21 + $0xe0] sm:$0x1] }
  0x49   : > { %v1023_v37 = vmul.f32 %v2246_v20, %v2858_v51  ;;  %v978_v43 = vadd.f32 %v946_v34, %v910_v26  ;;  %v1024_v44 = vmul.f32 %v2183_v13, %v2858_v51  ;;  %v1025_v45 = vmul.f32 %v2247_v25, %v2858_v51 }
  0x4a   : > { %v1717_v0 = vpack.c.bf16 %v1689_v29, %v1688_v27  ;;  %v694_v1 = vsel %vm646_vm1, %v692_v24, %v693_v54  ;;  %v696_v48 = vsel %vm646_vm1, %v693_v54, %v695_v35  ;;  %v979_v49 = vadd.f32 %v947_v33, %v911_v30  ;;  %v2168_v30 = vld [vmem:[%s2795_s21 + $0xf0] sm:$0xff]  ;;  %v2169_v35 = vld [vmem:[%s2795_s21 + $0x100] sm:$0xff] }
  0x4b   : > { %v1137_v50 = vrot.slane %v1023_v37, 1  ;;  %v777_v53 = vadd.f32 %v694_v1, %v532_v18  ;;  %v778_v55 = vadd.f32 %v696_v48, %v533_v19  ;;  %v1138_v58 = vrot.slane %v1024_v44, 1  ;;  %2484 = vmatpush3.bf16.msra.mxu1 %v2788_v7  ;;  %v414_v19 = vld [vmem:[%s2795_s21 + $0xc0] sm:$0xfe]  ;;  %v2201_v44 = vld [vmem:[%s2795_s21 + $0x108] sm:$0xff] }
  0x4c   : > { %2422 = vmatmul.mubr.bf16.gmra.mxu0 %v1717_v0  ;;  %v1140_v59 = vrot.slane %v1025_v45, 1  ;;  %v1381_v61 = vmul.f32 %v3081_v38, %v2868_v56  ;;  %v1382_v62 = vmul.f32 %v3087_v63, %v2868_v56  ;;  %v1415_v8 = vmul.f32 %v3090_v6, %v2870_v57  ;;  %2485 = vmatprep.subr.bf16.mxu1 %v2663_v2  ;;  %v2232_v45 = vld [vmem:[%s2795_s21 + $0xf0] sm:$0xfe] }
  0x4d   : > { %v1416_v9 = vmul.f32 %v3093_v46, %v2870_v57  ;;  %2425 = vmatprep.mubr.msk.bf16.mxu0 %vm2664_vm0, %v2663_v2  ;;  %v1139_v7 = vsel %vm646_vm1, %v1137_v50, %v1138_v58  ;;  %v1488_v12 = vmul.f32 %v2838_v36, %v2338_v52  ;;  %v1489_v13 = vmul.f32 %v2838_v36, %v3087_v63 }
  0x4e   : > { %v1141_v60 = vsel %vm646_vm1, %v1138_v58, %v1140_v59  ;;  %v1222_v15 = vadd.f32 %v1139_v7, %v978_v43  ;;  %v1445_v16 = vadd.f32 %v1415_v8, %v1381_v61  ;;  %v1490_v42 = vmul.f32 %v2838_v36, %v2339_v32  ;;  %v2200_v43 = vld [vmem:[%s2795_s21 + $0xf8] sm:$0xff] }
  0x4f   : > { %v1223_v39 = vadd.f32 %v1141_v60, %v979_v49  ;;  %v1446_v18 = vadd.f32 %v1416_v9, %v1382_v62  ;;  %v1596_v20 = vrot.slane %v1488_v12, 1  ;;  %v1597_v3 = vrot.slane %v1489_v13, 1  ;;  %2486 = vmatpush3.bf16.msra.mxu1 %v2850_v41  ;;  %v3155_v60 = vld [vmem:[%s2795_s21 + $0x130] sm:$0xff]  ;;  %v3158_v12 = vld [vmem:[%s2795_s21 + $0x128] sm:$0xff]  ;;  %v3161_v13 = vld [vmem:[%s2795_s21 + $0x138] sm:$0xff] }
  0x50   : > { %v450_v24 = vmul.f32 %v3016_v10, %v2805_v14  ;;  %v1254_v25 = vadd.f32 %v1222_v15, %v777_v53  ;;  %v451_v27 = vmul.f32 %v3019_v11, %v2805_v14  ;;  %v486_v29 = vmul.f32 %v3023_v5, %v2815_v21  ;;  %2487 = vmatprep.subr.bf16.mxu1 %v2663_v2 }
  0x51   : > { %v1255_v26 = vadd.f32 %v1223_v39, %v778_v55  ;;  %v1598_v34 = vsel %vm646_vm1, %v1596_v20, %v1597_v3  ;;  %v1599_v54 = vrot.slane %v1490_v42, 1  ;;  %v487_v41 = vmul.f32 %v3026_v17, %v2815_v21  ;;  %v2233_v55 = vld [vmem:[%s2795_s21 + $0x110] sm:$0x1] }
  0x52   : > { %v556_v10 = vmul.f32 %v2817_v22, %v414_v19  ;;  %v1674_v33 = vadd.f32 %v1598_v34, %v1445_v16  ;;  %v518_v37 = vadd.f32 %v486_v29, %v450_v24  ;;  %v557_v0 = vmul.f32 %v3019_v11, %v2817_v22  ;;  %v2324_v19 = vld [vmem:[%s2795_s21 + $0x120] sm:$0xfe]  ;;  %v2325_v24 = vld [vmem:[%s2795_s21 + $0x140] sm:$0x1] }
  0x53   : > { %v558_v5 = vmul.f32 %v2817_v22, %v415_v23  ;;  %v1600_v1 = vsel %vm646_vm1, %v1597_v3, %v1599_v54  ;;  %v519_v48 = vadd.f32 %v487_v41, %v451_v27  ;;  %v896_v17 = vmul.f32 %v2168_v30, %v2826_v28  ;;  %2488 = vmatpush3.bf16.msra.mxu1 %v2885_v4  ;;  %v3149_v4 = vld [vmem:[%s2795_s21 + $0x120] sm:$0xff] }
  0x54   : > { %v657_v49 = vrot.slane %v556_v10, 1  ;;  %v1675_v50 = vadd.f32 %v1600_v1, %v1446_v18  ;;  %v1704_v52 = vadd.f32 %v1674_v33, %v1254_v25  ;;  %v658_v11 = vrot.slane %v557_v0, 1  ;;  %2489 = vmatprep.subr.bf16.mxu1 %v2663_v2 }
  0x55   : > { %v660_v53 = vrot.slane %v558_v5, 1  ;;  %v897_v58 = vmul.f32 %v2169_v35, %v2826_v28  ;;  %v932_v59 = vmul.f32 %v2200_v43, %v2843_v40  ;;  %v933_v32 = vmul.f32 %v2201_v44, %v2843_v40 }
  0x56   : > { %v1002_v61 = vmul.f32 %v2232_v45, %v2858_v51  ;;  %v1705_v62 = vadd.f32 %v1675_v50, %v1255_v26  ;;  %v659_v8 = vsel %vm646_vm1, %v657_v49, %v658_v11  ;;  %v1003_v7 = vmul.f32 %v2169_v35, %v2858_v51  ;;  %v431_v49 = vld [vmem:[%s2795_s21 + $0x3e0] sm:$0x1] }
  0x57   : > { %v661_v9 = vsel %vm646_vm1, %v658_v11, %v660_v53  ;;  %v763_v15 = vadd.f32 %v659_v8, %v518_v37  ;;  %v964_v16 = vadd.f32 %v932_v59, %v896_v17  ;;  %v965_v18 = vadd.f32 %v933_v32, %v897_v58  ;;  %2490 = vmatpush3.bf16.msra.mxu1 %v2914_v31  ;;  %v430_v37 = vld [vmem:[%s2795_s21 + $0x3c0] sm:$0xfe]  ;;  %v2184_v11 = vld [vmem:[%s2795_s21 + $0x3f0] sm:$0xff] }
  0x58   : > { %v764_v39 = vadd.f32 %v661_v9, %v519_v48  ;;  %v1725_v42 = vpack.c.bf16 %v1705_v62, %v1704_v52  ;;  %v1004_v20 = vmul.f32 %v2233_v55, %v2858_v51  ;;  %v1102_v3 = vrot.slane %v1002_v61, 1  ;;  %2491 = vmatprep.subr.bf16.mxu1 %v2663_v2  ;;  %v2185_v32 = vld [vmem:[%s2795_s21 + $0x400] sm:$0xff]  ;;  %v2216_v61 = vld [vmem:[%s2795_s21 + $0x3f8] sm:$0xff] }
  0x59   : > { %v1103_v23 = vrot.slane %v1003_v7, 1  ;;  %v1367_v25 = vmul.f32 %v3149_v4, %v2868_v56  ;;  %v1368_v26 = vmul.f32 %v3155_v60, %v2868_v56  ;;  %v1401_v27 = vmul.f32 %v3158_v12, %v2870_v57  ;;  %v2248_v7 = vld [vmem:[%s2795_s21 + $0x3f0] sm:$0xfe] }
  0x5a   : > { %v1402_v31 = vmul.f32 %v3161_v13, %v2870_v57  ;;  %2454 = vmatmul.mubr.bf16.gmra.mxu1 %v1725_v42  ;;  %v1105_v30 = vrot.slane %v1004_v20, 1  ;;  %v1467_v34 = vmul.f32 %v2838_v36, %v2324_v19  ;;  %v1468_v54 = vmul.f32 %v2838_v36, %v3155_v60  ;;  %v2249_v42 = vld [vmem:[%s2795_s21 + $0x410] sm:$0x1] }
  0x5b   : > { %v1104_v29 = vsel %vm646_vm1, %v1102_v3, %v1103_v23  ;;  %2457 = vmatprep.mubr.msk.bf16.mxu1 %vm2664_vm0, %v2663_v2  ;;  %v1431_v10 = vadd.f32 %v1401_v27, %v1367_v25  ;;  %v1469_v33 = vmul.f32 %v2838_v36, %v2325_v24  ;;  %v466_v44 = vmul.f32 %v3081_v38, %v2805_v14  ;;  %v3215_v27 = vld [vmem:[%s2795_s21 + $0x420] sm:$0xff] }
  0x5c   : > { %v1208_v41 = vadd.f32 %v1104_v29, %v964_v16  ;;  %v1432_v35 = vadd.f32 %v1402_v31, %v1368_v26  ;;  %v1106_v0 = vsel %vm646_vm1, %v1103_v23, %v1105_v30  ;;  %v1561_v5 = vrot.slane %v1467_v34, 1  ;;  %2492 = vmatpush3.bf16.msra.mxu1 %v2927_v47  ;;  %v3218_v31 = vld [vmem:[%s2795_s21 + $0x430] sm:$0xff]  ;;  %v3221_v29 = vld [vmem:[%s2795_s21 + $0x428] sm:$0xff] }
  0x5d   : > { %v1562_v43 = vrot.slane %v1468_v54, 1  ;;  %v1209_v45 = vadd.f32 %v1106_v0, %v965_v18  ;;  %v1564_v48 = vrot.slane %v1469_v33, 1  ;;  %v467_v17 = vmul.f32 %v3087_v63, %v2805_v14 }
  0x5e   : > { %v1240_v1 = vadd.f32 %v1208_v41, %v763_v15  ;;  %v502_v52 = vmul.f32 %v3090_v6, %v2815_v21  ;;  %v503_v38 = vmul.f32 %v3093_v46, %v2815_v21  ;;  %v580_v47 = vmul.f32 %v2817_v22, %v430_v37  ;;  %v2217_v46 = vld [vmem:[%s2795_s21 + $0x408] sm:$0xff] }
  0x5f   : > { %v1563_v50 = vsel %vm646_vm1, %v1561_v5, %v1562_v43  ;;  %v1241_v53 = vadd.f32 %v1209_v45, %v764_v39  ;;  %v1565_v55 = vsel %vm646_vm1, %v1562_v43, %v1564_v48  ;;  %v581_v59 = vmul.f32 %v3087_v63, %v2817_v22  ;;  %v2341_v43 = vld [vmem:[%s2795_s21 + $0x440] sm:$0x1] }
  0x60   : > { %v1660_v58 = vadd.f32 %v1563_v50, %v1431_v10  ;;  %v1661_v62 = vadd.f32 %v1565_v55, %v1432_v35  ;;  %v534_v8 = vadd.f32 %v502_v52, %v466_v44  ;;  %v535_v9 = vadd.f32 %v503_v38, %v467_v17  ;;  %v3225_v10 = vld [vmem:[%s2795_s21 + $0x438] sm:$0xff]  ;;  %v2340_v35 = vld [vmem:[%s2795_s21 + $0x420] sm:$0xfe] }
  0x61   : > { %v582_v6 = vmul.f32 %v2817_v22, %v431_v49  ;;  %v697_v39 = vrot.slane %v580_v47, 1  ;;  %v698_v16 = vrot.slane %v581_v59, 1  ;;  %v912_v18 = vmul.f32 %v2184_v11, %v2826_v28 }
  0x62   : > { %v1690_v15 = vadd.f32 %v1660_v58, %v1240_v1  ;;  %v1691_v19 = vadd.f32 %v1661_v62, %v1241_v53  ;;  %v913_v20 = vmul.f32 %v2185_v32, %v2826_v28  ;;  %v948_v3 = vmul.f32 %v2216_v61, %v2843_v40  ;;  %v416_v53 = vld [vmem:[%s2795_s21 + $0x120] sm:$0xfe] }
  0x63   : > { %v700_v63 = vrot.slane %v582_v6, 1  ;;  %v699_v23 = vsel %vm646_vm1, %v697_v39, %v698_v16  ;;  %v949_v24 = vmul.f32 %v2217_v46, %v2843_v40  ;;  %v1026_v25 = vmul.f32 %v2248_v7, %v2858_v51  ;;  %v417_v7 = vld [vmem:[%s2795_s21 + $0x140] sm:$0x1] }
  0x64   : > { %v1027_v26 = vmul.f32 %v2185_v32, %v2858_v51  ;;  %v1718_v30 = vpack.c.bf16 %v1691_v19, %v1690_v15  ;;  %v779_v54 = vadd.f32 %v699_v23, %v534_v8  ;;  %v980_v41 = vadd.f32 %v948_v3, %v912_v18  ;;  %v2202_v3 = vld [vmem:[%s2795_s21 + $0x158] sm:$0xff] }
  0x65   : > { %v701_v34 = vsel %vm646_vm1, %v698_v16, %v700_v63  ;;  %v981_v37 = vadd.f32 %v949_v24, %v913_v20  ;;  %v1028_v0 = vmul.f32 %v2249_v42, %v2858_v51  ;;  %v1142_v5 = vrot.slane %v1026_v25, 1  ;;  %v2170_v16 = vld [vmem:[%s2795_s21 + $0x150] sm:$0xff]  ;;  %v2171_v20 = vld [vmem:[%s2795_s21 + $0x160] sm:$0xff] }
  0x66   : > { %v780_v33 = vadd.f32 %v701_v34, %v535_v9  ;;  %2426 = vmatmul.mubr.bf16.gmra.mxu0 %v1718_v30  ;;  %v1143_v44 = vrot.slane %v1027_v26, 1  ;;  %v1383_v45 = vmul.f32 %v3215_v27, %v2868_v56  ;;  %v1384_v1 = vmul.f32 %v3218_v31, %v2868_v56  ;;  %v2234_v26 = vld [vmem:[%s2795_s21 + $0x150] sm:$0xfe] }
  0x67   : > { %v1417_v48 = vmul.f32 %v3221_v29, %v2870_v57  ;;  %v1145_v49 = vrot.slane %v1028_v0, 1  ;;  %v1418_v17 = vmul.f32 %v3225_v10, %v2870_v57  ;;  %v1491_v50 = vmul.f32 %v2838_v36, %v2340_v35  ;;  %2429 = vmatprep.mubr.msk.bf16.mxu0 %vm2664_vm0, %v2663_v2 }
  0x68   : > { %v1492_v52 = vmul.f32 %v2838_v36, %v3218_v31  ;;  %v1144_v38 = vsel %vm646_vm1, %v1142_v5, %v1143_v44  ;;  %v1493_v11 = vmul.f32 %v2838_v36, %v2341_v43  ;;  %v452_v55 = vmul.f32 %v3149_v4, %v2805_v14 }
  0x69   : > { %v1447_v47 = vadd.f32 %v1417_v48, %v1383_v45  ;;  %v1146_v58 = vsel %vm646_vm1, %v1143_v44, %v1145_v49  ;;  %v1224_v59 = vadd.f32 %v1144_v38, %v980_v41  ;;  %v1448_v32 = vadd.f32 %v1418_v17, %v1384_v1  ;;  %v3275_v1 = vld [vmem:[%s2795_s21 + $0x180] sm:$0xff]  ;;  %v3278_v48 = vld [vmem:[%s2795_s21 + $0x190] sm:$0xff]  ;;  %v3282_v38 = vld [vmem:[%s2795_s21 + $0x188] sm:$0xff] }
  0x6a   : > { %v1601_v61 = vrot.slane %v1491_v50, 1  ;;  %v1225_v62 = vadd.f32 %v1146_v58, %v981_v37  ;;  %v1602_v8 = vrot.slane %v1492_v52, 1  ;;  %v1604_v9 = vrot.slane %v1493_v11, 1  ;;  %v2326_v11 = vld [vmem:[%s2795_s21 + $0x180] sm:$0xfe] }
  0x6b   : > { %v453_v6 = vmul.f32 %v3155_v60, %v2805_v14  ;;  %v1256_v46 = vadd.f32 %v1224_v59, %v779_v54  ;;  %v488_v4 = vmul.f32 %v3158_v12, %v2815_v21  ;;  %v489_v15 = vmul.f32 %v3161_v13, %v2815_v21  ;;  %v2203_v13 = vld [vmem:[%s2795_s21 + $0x168] sm:$0xff] }
  0x6c   : > { %v559_v39 = vmul.f32 %v2817_v22, %v416_v53  ;;  %v1257_v18 = vadd.f32 %v1225_v62, %v780_v33  ;;  %v1603_v19 = vsel %vm646_vm1, %v1601_v61, %v1602_v8  ;;  %v1605_v63 = vsel %vm646_vm1, %v1602_v8, %v1604_v9  ;;  %v2235_v33 = vld [vmem:[%s2795_s21 + $0x170] sm:$0x1] }
  0x6d   : > { %v560_v42 = vmul.f32 %v3155_v60, %v2817_v22  ;;  %v1676_v23 = vadd.f32 %v1603_v19, %v1447_v47  ;;  %v1677_v24 = vadd.f32 %v1605_v63, %v1448_v32  ;;  %v520_v12 = vadd.f32 %v488_v4, %v452_v55  ;;  %v3285_v47 = vld [vmem:[%s2795_s21 + $0x198] sm:$0xff]  ;;  %v2327_v32 = vld [vmem:[%s2795_s21 + $0x1a0] sm:$0x1] }
  0x6e   : > { %v521_v25 = vadd.f32 %v489_v15, %v453_v6  ;;  %v561_v30 = vmul.f32 %v2817_v22, %v417_v7  ;;  %v662_v34 = vrot.slane %v559_v39, 1  ;;  %v898_v41 = vmul.f32 %v2170_v16, %v2826_v28 }
  0x6f   : > { %v663_v54 = vrot.slane %v560_v42, 1  ;;  %v1706_v35 = vadd.f32 %v1676_v23, %v1256_v46  ;;  %v1707_v60 = vadd.f32 %v1677_v24, %v1257_v18  ;;  %v899_v37 = vmul.f32 %v2171_v20, %v2826_v28 }
  0x70   : > { %v934_v0 = vmul.f32 %v2202_v3, %v2843_v40  ;;  %v665_v43 = vrot.slane %v561_v30, 1  ;;  %v935_v44 = vmul.f32 %v2203_v13, %v2843_v40  ;;  %v1005_v45 = vmul.f32 %v2234_v26, %v2858_v51  ;;  %v432_v3 = vld [vmem:[%s2795_s21 + $0x420] sm:$0xfe]  ;;  %v433_v26 = vld [vmem:[%s2795_s21 + $0x440] sm:$0x1] }
  0x71   : > { %v664_v5 = vsel %vm646_vm1, %v662_v34, %v663_v54  ;;  %v1726_v49 = vpack.c.bf16 %v1707_v60, %v1706_v35  ;;  %v1006_v52 = vmul.f32 %v2171_v20, %v2858_v51  ;;  %v1007_v58 = vmul.f32 %v2235_v33, %v2858_v51  ;;  %v2186_v34 = vld [vmem:[%s2795_s21 + $0x450] sm:$0xff]  ;;  %v2187_v33 = vld [vmem:[%s2795_s21 + $0x460] sm:$0xff] }
  0x72   : > { %v765_v17 = vadd.f32 %v664_v5, %v520_v12  ;;  %v966_v50 = vadd.f32 %v934_v0, %v898_v41  ;;  %v666_v53 = vsel %vm646_vm1, %v663_v54, %v665_v43  ;;  %v967_v55 = vadd.f32 %v935_v44, %v899_v37  ;;  %v2218_v37 = vld [vmem:[%s2795_s21 + $0x458] sm:$0xff] }
  0x73   : > { %v1107_v59 = vrot.slane %v1005_v45, 1  ;;  %2458 = vmatmul.mubr.bf16.gmra.mxu1 %v1726_v49  ;;  %v766_v61 = vadd.f32 %v666_v53, %v521_v25  ;;  %v1108_v62 = vrot.slane %v1006_v52, 1  ;;  %v1369_v8 = vmul.f32 %v3275_v1, %v2868_v56  ;;  %v2250_v45 = vld [vmem:[%s2795_s21 + $0x450] sm:$0xfe] }
  0x74   : > { %v1370_v9 = vmul.f32 %v3278_v48, %v2868_v56  ;;  %2461 = vmatprep.mubr.msk.bf16.mxu1 %vm2664_vm0, %v2663_v2  ;;  %v1110_v6 = vrot.slane %v1007_v58, 1  ;;  %v1403_v46 = vmul.f32 %v3282_v38, %v2870_v57  ;;  %v1404_v7 = vmul.f32 %v3285_v47, %v2870_v57 }
  0x75   : > { %v1470_v4 = vmul.f32 %v2838_v36, %v2326_v11  ;;  %v1109_v15 = vsel %vm646_vm1, %v1107_v59, %v1108_v62  ;;  %v1471_v39 = vmul.f32 %v2838_v36, %v3278_v48  ;;  %v1472_v16 = vmul.f32 %v2838_v36, %v2327_v32 }
  0x76   : > { %v468_v18 = vmul.f32 %v3215_v27, %v2805_v14  ;;  %v1111_v19 = vsel %vm646_vm1, %v1108_v62, %v1110_v6  ;;  %v1210_v63 = vadd.f32 %v1109_v15, %v966_v50  ;;  %v1433_v42 = vadd.f32 %v1403_v46, %v1369_v8  ;;  %v2251_v50 = vld [vmem:[%s2795_s21 + $0x470] sm:$0x1]  ;;  %v3335_v62 = vld [vmem:[%s2795_s21 + $0x480] sm:$0xff]  ;;  %v3346_v15 = vld [vmem:[%s2795_s21 + $0x498] sm:$0xff] }
  0x77   : > { %v1434_v20 = vadd.f32 %v1404_v7, %v1370_v9  ;;  %v1211_v23 = vadd.f32 %v1111_v19, %v967_v55  ;;  %v1566_v24 = vrot.slane %v1470_v4, 1  ;;  %v1567_v12 = vrot.slane %v1471_v39, 1  ;;  %v3340_v7 = vld [vmem:[%s2795_s21 + $0x490] sm:$0xff]  ;;  %v3343_v4 = vld [vmem:[%s2795_s21 + $0x488] sm:$0xff] }
  0x78   : > { %v1569_v25 = vrot.slane %v1472_v16, 1  ;;  %v1242_v13 = vadd.f32 %v1210_v63, %v765_v17  ;;  %v469_v36 = vmul.f32 %v3218_v31, %v2805_v14  ;;  %v504_v27 = vmul.f32 %v3221_v29, %v2815_v21  ;;  %v2219_v29 = vld [vmem:[%s2795_s21 + $0x468] sm:$0xff]  ;;  %v2342_v63 = vld [vmem:[%s2795_s21 + $0x480] sm:$0xfe] }
  0x79   : > { %v505_v30 = vmul.f32 %v3225_v10, %v2815_v21  ;;  %v1243_v54 = vadd.f32 %v1211_v23, %v766_v61  ;;  %v1568_v41 = vsel %vm646_vm1, %v1566_v24, %v1567_v12  ;;  %v583_v60 = vmul.f32 %v2817_v22, %v432_v3  ;;  %v2343_v24 = vld [vmem:[%s2795_s21 + $0x4a0] sm:$0x1] }
  0x7a   : > { %v1570_v35 = vsel %vm646_vm1, %v1567_v12, %v1569_v25  ;;  %v1662_v0 = vadd.f32 %v1568_v41, %v1433_v42  ;;  %v536_v43 = vadd.f32 %v504_v27, %v468_v18  ;;  %v584_v10 = vmul.f32 %v3218_v31, %v2817_v22 }
  0x7b   : > { %v1663_v5 = vadd.f32 %v1570_v35, %v1434_v20  ;;  %v537_v44 = vadd.f32 %v505_v30, %v469_v36  ;;  %v585_v49 = vmul.f32 %v2817_v22, %v433_v26  ;;  %v702_v17 = vrot.slane %v583_v60, 1  ;;  %v3367_v30 = vld [vmem:[%s3937_s2 + $0x8] ss:$0 sm:$0xff] }
  0x7c   : > { %v914_v52 = vmul.f32 %v2186_v34, %v2826_v28  ;;  %v1692_v11 = vadd.f32 %v1662_v0, %v1242_v13  ;;  %v915_v55 = vmul.f32 %v2187_v33, %v2826_v28  ;;  %v950_v58 = vmul.f32 %v2218_v37, %v2843_v40  ;;  %v418_v37 = vld [vmem:[%s2795_s21 + $0x180] sm:$0xfe] }
  0x7d   : > { %v1693_v53 = vadd.f32 %v1663_v5, %v1243_v54  ;;  %v703_v59 = vrot.slane %v584_v10, 1  ;;  %v705_v32 = vrot.slane %v585_v49, 1  ;;  %v951_v31 = vmul.f32 %v2219_v29, %v2843_v40 }
  0x7e   : > { %v1029_v61 = vmul.f32 %v2250_v45, %v2858_v51  ;;  %v982_v9 = vadd.f32 %v950_v58, %v914_v52  ;;  %v1030_v6 = vmul.f32 %v2187_v33, %v2858_v51  ;;  %v1031_v46 = vmul.f32 %v2251_v50, %v2858_v51  ;;  %v2172_v50 = vld [vmem:[%s2795_s21 + $0x1b0] sm:$0xff] }
  0x7f   : > { %v1719_v8 = vpack.c.bf16 %v1693_v53, %v1692_v11  ;;  %v704_v39 = vsel %vm646_vm1, %v702_v17, %v703_v59  ;;  %v706_v16 = vsel %vm646_vm1, %v703_v59, %v705_v32  ;;  %v983_v18 = vadd.f32 %v951_v31, %v915_v55 }
  0x80   : > { %v1147_v19 = vrot.slane %v1029_v61, 1  ;;  %v781_v42 = vadd.f32 %v704_v39, %v536_v43  ;;  %v782_v20 = vadd.f32 %v706_v16, %v537_v44  ;;  %v1148_v3 = vrot.slane %v1030_v6, 1  ;;  %v419_v44 = vld [vmem:[%s2795_s21 + $0x1a0] sm:$0x1]  ;;  %v2204_v61 = vld [vmem:[%s2795_s21 + $0x1b8] sm:$0xff] }
  0x81   : > { %2430 = vmatmul.mubr.bf16.gmra.mxu0 %v1719_v8  ;;  %v1150_v23 = vrot.slane %v1031_v46, 1  ;;  %v1385_v12 = vmul.f32 %v3335_v62, %v2868_v56  ;;  %v1386_v25 = vmul.f32 %v3340_v7, %v2868_v56  ;;  %v1419_v13 = vmul.f32 %v3343_v4, %v2870_v57  ;;  %v2236_v8 = vld [vmem:[%s2795_s21 + $0x1b0] sm:$0xfe] }
  0x82   : > { %v1420_v26 = vmul.f32 %v3346_v15, %v2870_v57  ;;  %2433 = vmatprep.mubr.msk.bf16.mxu0 %vm2664_vm0, %v2663_v2  ;;  %v1149_v36 = vsel %vm646_vm1, %v1147_v19, %v1148_v3  ;;  %v1494_v34 = vmul.f32 %v3367_v30, %v2342_v63  ;;  %v1495_v54 = vmul.f32 %v3367_v30, %v3340_v7 }
  0x83   : > { %v1151_v27 = vsel %vm646_vm1, %v1148_v3, %v1150_v23  ;;  %v1226_v41 = vadd.f32 %v1149_v36, %v982_v9  ;;  %v1449_v60 = vadd.f32 %v1419_v13, %v1385_v12  ;;  %v1496_v0 = vmul.f32 %v3367_v30, %v2343_v24  ;;  %v3401_v23 = vld [vmem:[%s2795_s21 + $0x1e0] sm:$0xff]  ;;  %v3410_v36 = vld [vmem:[%s2795_s21 + $0x1e8] sm:$0xff] }
  0x84   : > { %v1227_v35 = vadd.f32 %v1151_v27, %v983_v18  ;;  %v1450_v33 = vadd.f32 %v1420_v26, %v1386_v25  ;;  %v1606_v5 = vrot.slane %v1494_v34, 1  ;;  %v1607_v43 = vrot.slane %v1495_v54, 1  ;;  %v3407_v26 = vld [vmem:[%s2795_s21 + $0x1f0] sm:$0xff]  ;;  %v3413_v27 = vld [vmem:[%s2795_s21 + $0x1f8] sm:$0xff] }
  0x85   : > { %v454_v29 = vmul.f32 %v3275_v1, %v2805_v14  ;;  %v1258_v45 = vadd.f32 %v1226_v41, %v781_v42  ;;  %v455_v49 = vmul.f32 %v3278_v48, %v2805_v14  ;;  %v490_v17 = vmul.f32 %v3282_v38, %v2815_v21  ;;  %v2173_v1 = vld [vmem:[%s2795_s21 + $0x1c0] sm:$0xff]  ;;  %v2205_v38 = vld [vmem:[%s2795_s21 + $0x1c8] sm:$0xff] }
  0x86   : > { %v1259_v10 = vadd.f32 %v1227_v35, %v782_v20  ;;  %v1608_v52 = vsel %vm646_vm1, %v1606_v5, %v1607_v43  ;;  %v1609_v11 = vrot.slane %v1496_v0, 1  ;;  %v491_v53 = vmul.f32 %v3285_v47, %v2815_v21 }
  0x87   : > { %v562_v55 = vmul.f32 %v2817_v22, %v418_v37  ;;  %v1678_v58 = vadd.f32 %v1608_v52, %v1449_v60  ;;  %v522_v59 = vadd.f32 %v490_v17, %v454_v29  ;;  %v563_v32 = vmul.f32 %v3278_v48, %v2817_v22  ;;  %v2237_v48 = vld [vmem:[%s2795_s21 + $0x1d0] sm:$0x1]  ;;  %v2328_v60 = vld [vmem:[%s2795_s21 + $0x1e0] sm:$0xfe] }
  0x88   : > { %v564_v31 = vmul.f32 %v2817_v22, %v419_v44  ;;  %v1610_v9 = vsel %vm646_vm1, %v1607_v43, %v1609_v11  ;;  %v523_v6 = vadd.f32 %v491_v53, %v455_v49  ;;  %v900_v47 = vmul.f32 %v2172_v50, %v2826_v28  ;;  %v2329_v43 = vld [vmem:[%s2795_s21 + $0x200] sm:$0x1] }
  0x89   : > { %v667_v46 = vrot.slane %v562_v55, 1  ;;  %v1679_v39 = vadd.f32 %v1610_v9, %v1450_v33  ;;  %v1708_v16 = vadd.f32 %v1678_v58, %v1258_v45  ;;  %v668_v18 = vrot.slane %v563_v32, 1  ;;  %v434_v58 = vld [vmem:[%s2795_s21 + $0x480] sm:$0xfe] }
  0x8a   : > { %v670_v19 = vrot.slane %v564_v31, 1  ;;  %v901_v63 = vmul.f32 %v2173_v1, %v2826_v28  ;;  %v936_v42 = vmul.f32 %v2204_v61, %v2843_v40  ;;  %v937_v20 = vmul.f32 %v2205_v38, %v2843_v40 }
  0x8b   : > { %v1008_v3 = vmul.f32 %v2236_v8, %v2858_v51  ;;  %v1709_v24 = vadd.f32 %v1679_v39, %v1259_v10  ;;  %v669_v12 = vsel %vm646_vm1, %v667_v46, %v668_v18  ;;  %v1009_v13 = vmul.f32 %v2173_v1, %v2858_v51 }
  0x8c   : > { %v671_v25 = vsel %vm646_vm1, %v668_v18, %v670_v19  ;;  %v767_v34 = vadd.f32 %v669_v12, %v522_v59  ;;  %v968_v41 = vadd.f32 %v936_v42, %v900_v47  ;;  %v969_v35 = vadd.f32 %v937_v20, %v901_v63  ;;  %v2188_v18 = vld [vmem:[%s2795_s21 + $0x4b0] sm:$0xff]  ;;  %v2189_v20 = vld [vmem:[%s2795_s21 + $0x4c0] sm:$0xff] }
  0x8d   : > { %v768_v54 = vadd.f32 %v671_v25, %v523_v6  ;;  %v1727_v33 = vpack.c.bf16 %v1709_v24, %v1708_v16  ;;  %v1010_v37 = vmul.f32 %v2237_v48, %v2858_v51  ;;  %v1112_v0 = vrot.slane %v1008_v3, 1  ;;  %v435_v6 = vld [vmem:[%s2795_s21 + $0x4a0] sm:$0x1]  ;;  %v2220_v3 = vld [vmem:[%s2795_s21 + $0x4b8] sm:$0xff] }
  0x8e   : > { %v1113_v5 = vrot.slane %v1009_v13, 1  ;;  %v1371_v44 = vmul.f32 %v3401_v23, %v2868_v56  ;;  %v1372_v29 = vmul.f32 %v3407_v26, %v2868_v56  ;;  %v1405_v45 = vmul.f32 %v3410_v36, %v2870_v57  ;;  %v2252_v13 = vld [vmem:[%s2795_s21 + $0x4b0] sm:$0xfe] }
  0x8f   : > { %v1406_v10 = vmul.f32 %v3413_v27, %v2870_v57  ;;  %2462 = vmatmul.mubr.bf16.gmra.mxu1 %v1727_v33  ;;  %v1115_v17 = vrot.slane %v1010_v37, 1  ;;  %v1473_v50 = vmul.f32 %v3367_v30, %v2328_v60  ;;  %v1474_v52 = vmul.f32 %v3367_v30, %v3407_v26  ;;  %v2253_v33 = vld [vmem:[%s2795_s21 + $0x4d0] sm:$0x1] }
  0x90   : > { %v1114_v49 = vsel %vm646_vm1, %v1112_v0, %v1113_v5  ;;  %2465 = vmatprep.mubr.msk.bf16.mxu1 %vm2664_vm0, %v2663_v2  ;;  %v1435_v53 = vadd.f32 %v1405_v45, %v1371_v44  ;;  %v1475_v1 = vmul.f32 %v3367_v30, %v2329_v43  ;;  %v470_v61 = vmul.f32 %v3335_v62, %v2805_v14  ;;  %v3464_v45 = vld [vmem:[%s2795_s21 + $0x4e0] sm:$0xff] }
  0x91   : > { %v1212_v11 = vadd.f32 %v1114_v49, %v968_v41  ;;  %v1436_v55 = vadd.f32 %v1406_v10, %v1372_v29  ;;  %v1116_v59 = vsel %vm646_vm1, %v1113_v5, %v1115_v17  ;;  %v1571_v32 = vrot.slane %v1473_v50, 1  ;;  %v3467_v10 = vld [vmem:[%s2795_s21 + $0x4f0] sm:$0xff]  ;;  %v3470_v49 = vld [vmem:[%s2795_s21 + $0x4e8] sm:$0xff] }
  0x92   : > { %v1572_v31 = vrot.slane %v1474_v52, 1  ;;  %v1213_v38 = vadd.f32 %v1116_v59, %v969_v35  ;;  %v1574_v9 = vrot.slane %v1475_v1, 1  ;;  %v471_v46 = vmul.f32 %v3340_v7, %v2805_v14 }
  0x93   : > { %v1244_v8 = vadd.f32 %v1212_v11, %v767_v34  ;;  %v506_v39 = vmul.f32 %v3343_v4, %v2815_v21  ;;  %v507_v16 = vmul.f32 %v3346_v15, %v2815_v21  ;;  %v586_v62 = vmul.f32 %v2817_v22, %v434_v58  ;;  %v2221_v15 = vld [vmem:[%s2795_s21 + $0x4c8] sm:$0xff] }
  0x94   : > { %v1573_v47 = vsel %vm646_vm1, %v1571_v32, %v1572_v31  ;;  %v1245_v19 = vadd.f32 %v1213_v38, %v768_v54  ;;  %v1575_v48 = vsel %vm646_vm1, %v1572_v31, %v1574_v9  ;;  %v587_v42 = vmul.f32 %v3340_v7, %v2817_v22  ;;  %v2345_v31 = vld [vmem:[%s2795_s21 + $0x500] sm:$0x1] }
  0x95   : > { %v1664_v63 = vadd.f32 %v1573_v47, %v1435_v53  ;;  %v1665_v24 = vadd.f32 %v1575_v48, %v1436_v55  ;;  %v538_v12 = vadd.f32 %v506_v39, %v470_v61  ;;  %v539_v25 = vadd.f32 %v507_v16, %v471_v46  ;;  %v3474_v53 = vld [vmem:[%s2795_s21 + $0x4f8] sm:$0xff]  ;;  %v2344_v55 = vld [vmem:[%s2795_s21 + $0x4e0] sm:$0xfe] }
  0x96   : > { %v588_v4 = vmul.f32 %v2817_v22, %v435_v6  ;;  %v707_v54 = vrot.slane %v586_v62, 1  ;;  %v708_v41 = vrot.slane %v587_v42, 1  ;;  %v916_v35 = vmul.f32 %v2188_v18, %v2826_v28 }
  0x97   : > { %v1694_v34 = vadd.f32 %v1664_v63, %v1244_v8  ;;  %v1695_v60 = vadd.f32 %v1665_v24, %v1245_v19  ;;  %v917_v37 = vmul.f32 %v2189_v20, %v2826_v28  ;;  %v952_v0 = vmul.f32 %v2220_v3, %v2843_v40  ;;  %v420_v19 = vld [vmem:[%s2795_s21 + $0x1e0] sm:$0xfe] }
  0x98   : > { %v710_v7 = vrot.slane %v588_v4, 1  ;;  %v709_v5 = vsel %vm646_vm1, %v707_v54, %v708_v41  ;;  %v953_v43 = vmul.f32 %v2221_v15, %v2843_v40  ;;  %v1032_v44 = vmul.f32 %v2252_v13, %v2858_v51  ;;  %v421_v13 = vld [vmem:[%s2795_s21 + $0x200] sm:$0x1] }
  0x99   : > { %v1033_v29 = vmul.f32 %v2189_v20, %v2858_v51  ;;  %v1720_v17 = vpack.c.bf16 %v1695_v60, %v1694_v34  ;;  %v783_v52 = vadd.f32 %v709_v5, %v538_v12  ;;  %v984_v11 = vadd.f32 %v952_v0, %v916_v35  ;;  %v2206_v0 = vld [vmem:[%s2795_s21 + $0x218] sm:$0xff] }
  0x9a   : > { %v711_v50 = vsel %vm646_vm1, %v708_v41, %v710_v7  ;;  %v985_v58 = vadd.f32 %v953_v43, %v917_v37  ;;  %v1034_v59 = vmul.f32 %v2253_v33, %v2858_v51  ;;  %v1152_v32 = vrot.slane %v1032_v44, 1  ;;  %v2174_v41 = vld [vmem:[%s2795_s21 + $0x210] sm:$0xff]  ;;  %v2175_v37 = vld [vmem:[%s2795_s21 + $0x220] sm:$0xff] }
  0x9b   : > { %v784_v1 = vadd.f32 %v711_v50, %v539_v25  ;;  %2434 = vmatmul.mubr.bf16.gmra.mxu0 %v1720_v17  ;;  %v1153_v61 = vrot.slane %v1033_v29, 1  ;;  %v1387_v38 = vmul.f32 %v3464_v45, %v2868_v56  ;;  %v1388_v8 = vmul.f32 %v3467_v10, %v2868_v56  ;;  %v2238_v29 = vld [vmem:[%s2795_s21 + $0x210] sm:$0xfe] }
  0x9c   : > { %v1421_v9 = vmul.f32 %v3470_v49, %v2870_v57  ;;  %v1155_v6 = vrot.slane %v1034_v59, 1  ;;  %v1422_v46 = vmul.f32 %v3474_v53, %v2870_v57  ;;  %v1497_v47 = vmul.f32 %v3367_v30, %v2344_v55  ;;  %2437 = vmatprep.mubr.msk.bf16.mxu0 %vm2664_vm0, %v2663_v2 }
  0x9d   : > { %v1498_v39 = vmul.f32 %v3367_v30, %v3467_v10  ;;  %v1154_v16 = vsel %vm646_vm1, %v1152_v32, %v1153_v61  ;;  %v1499_v18 = vmul.f32 %v3367_v30, %v2345_v31  ;;  %v456_v48 = vmul.f32 %v3401_v23, %v2805_v14 }
  0x9e   : > { %v1451_v62 = vadd.f32 %v1421_v9, %v1387_v38  ;;  %v1156_v63 = vsel %vm646_vm1, %v1153_v61, %v1155_v6  ;;  %v1228_v42 = vadd.f32 %v1154_v16, %v984_v11  ;;  %v1452_v20 = vadd.f32 %v1422_v46, %v1388_v8  ;;  %v3524_v8 = vld [vmem:[%s2795_s21 + $0x240] sm:$0xff]  ;;  %v3527_v9 = vld [vmem:[%s2795_s21 + $0x250] sm:$0xff]  ;;  %v3531_v16 = vld [vmem:[%s2795_s21 + $0x248] sm:$0xff] }
  0x9f   : > { %v1611_v3 = vrot.slane %v1497_v47, 1  ;;  %v1229_v24 = vadd.f32 %v1156_v63, %v985_v58  ;;  %v1612_v12 = vrot.slane %v1498_v39, 1  ;;  %v1614_v25 = vrot.slane %v1499_v18, 1  ;;  %v2330_v18 = vld [vmem:[%s2795_s21 + $0x240] sm:$0xfe] }
  0xa0   : > { %v457_v4 = vmul.f32 %v3407_v26, %v2805_v14  ;;  %v1260_v15 = vadd.f32 %v1228_v42, %v783_v52  ;;  %v492_v23 = vmul.f32 %v3410_v36, %v2815_v21  ;;  %v493_v34 = vmul.f32 %v3413_v27, %v2815_v21  ;;  %v2207_v27 = vld [vmem:[%s2795_s21 + $0x228] sm:$0xff] }
  0xa1   : > { %v565_v54 = vmul.f32 %v2817_v22, %v420_v19  ;;  %v1261_v35 = vadd.f32 %v1229_v24, %v784_v1  ;;  %v1613_v60 = vsel %vm646_vm1, %v1611_v3, %v1612_v12  ;;  %v1615_v7 = vsel %vm646_vm1, %v1612_v12, %v1614_v25  ;;  %v2239_v1 = vld [vmem:[%s2795_s21 + $0x230] sm:$0x1] }
  0xa2   : > { %v566_v33 = vmul.f32 %v3407_v26, %v2817_v22  ;;  %v1680_v5 = vadd.f32 %v1613_v60, %v1451_v62  ;;  %v1681_v43 = vadd.f32 %v1615_v7, %v1452_v20  ;;  %v524_v36 = vadd.f32 %v492_v23, %v456_v48  ;;  %v3534_v62 = vld [vmem:[%s2795_s21 + $0x258] sm:$0xff]  ;;  %v2331_v20 = vld [vmem:[%s2795_s21 + $0x260] sm:$0x1] }
  0xa3   : > { %v525_v44 = vadd.f32 %v493_v34, %v457_v4  ;;  %v567_v17 = vmul.f32 %v2817_v22, %v421_v13  ;;  %v672_v50 = vrot.slane %v565_v54, 1  ;;  %v902_v11 = vmul.f32 %v2174_v41, %v2826_v28 }
  0xa4   : > { %v673_v52 = vrot.slane %v566_v33, 1  ;;  %v1710_v55 = vadd.f32 %v1680_v5, %v1260_v15  ;;  %v1711_v26 = vadd.f32 %v1681_v43, %v1261_v35  ;;  %v903_v58 = vmul.f32 %v2175_v37, %v2826_v28 }
  0xa5   : > { %v938_v59 = vmul.f32 %v2206_v0, %v2843_v40  ;;  %v675_v31 = vrot.slane %v567_v17, 1  ;;  %v939_v61 = vmul.f32 %v2207_v27, %v2843_v40  ;;  %v1011_v38 = vmul.f32 %v2238_v29, %v2858_v51  ;;  %v436_v0 = vld [vmem:[%s2795_s21 + $0x4e0] sm:$0xfe]  ;;  %v437_v29 = vld [vmem:[%s2795_s21 + $0x500] sm:$0x1] }
  0xa6   : > { %v674_v32 = vsel %vm646_vm1, %v672_v50, %v673_v52  ;;  %v1728_v6 = vpack.c.bf16 %v1711_v26, %v1710_v55  ;;  %v1012_v39 = vmul.f32 %v2175_v37, %v2858_v51  ;;  %v1013_v63 = vmul.f32 %v2239_v1, %v2858_v51 }
  0xa7   : > { %v769_v46 = vadd.f32 %v674_v32, %v524_v36  ;;  %v970_v47 = vadd.f32 %v938_v59, %v902_v11  ;;  %v676_v19 = vsel %vm646_vm1, %v673_v52, %v675_v31  ;;  %v971_v48 = vadd.f32 %v939_v61, %v903_v58  ;;  %v2190_v52 = vld [vmem:[%s2795_s21 + $0x510] sm:$0xff]  ;;  %v2191_v58 = vld [vmem:[%s2795_s21 + $0x520] sm:$0xff]  ;;  %v2222_v59 = vld [vmem:[%s2795_s21 + $0x518] sm:$0xff] }
  0xa8   : > { %v1117_v42 = vrot.slane %v1011_v38, 1  ;;  %2466 = vmatmul.mubr.bf16.gmra.mxu1 %v1728_v6  ;;  %v770_v3 = vadd.f32 %v676_v19, %v525_v44  ;;  %v1118_v24 = vrot.slane %v1012_v39, 1  ;;  %v1373_v12 = vmul.f32 %v3524_v8, %v2868_v56  ;;  %v2254_v6 = vld [vmem:[%s2795_s21 + $0x510] sm:$0xfe]  ;;  %v2255_v39 = vld [vmem:[%s2795_s21 + $0x530] sm:$0x1] }
  0xa9   : > { %v1374_v25 = vmul.f32 %v3527_v9, %v2868_v56  ;;  %2469 = vmatprep.mubr.msk.bf16.mxu1 %vm2664_vm0, %v2663_v2  ;;  %v1120_v4 = vrot.slane %v1013_v63, 1  ;;  %v1407_v15 = vmul.f32 %v3531_v16, %v2870_v57  ;;  %v1408_v13 = vmul.f32 %v3534_v62, %v2870_v57 }
  0xaa   : > { %v1476_v23 = vmul.f32 %v3367_v30, %v2330_v18  ;;  %v1119_v34 = vsel %vm646_vm1, %v1117_v42, %v1118_v24  ;;  %v1477_v54 = vmul.f32 %v3367_v30, %v3527_v9  ;;  %v1478_v41 = vmul.f32 %v3367_v30, %v2331_v20 }
  0xab   : > { %v472_v35 = vmul.f32 %v3464_v45, %v2805_v14  ;;  %v1121_v60 = vsel %vm646_vm1, %v1118_v24, %v1120_v4  ;;  %v1214_v7 = vadd.f32 %v1119_v34, %v970_v47  ;;  %v1437_v33 = vadd.f32 %v1407_v15, %v1373_v12  ;;  %v3584_v12 = vld [vmem:[%s2795_s21 + $0x540] sm:$0xff]  ;;  %v3592_v34 = vld [vmem:[%s2795_s21 + $0x548] sm:$0xff] }
  0xac   : > { %v1438_v37 = vadd.f32 %v1408_v13, %v1374_v25  ;;  %v1215_v5 = vadd.f32 %v1121_v60, %v971_v48  ;;  %v1576_v43 = vrot.slane %v1476_v23, 1  ;;  %v1577_v36 = vrot.slane %v1477_v54, 1  ;;  %v3589_v23 = vld [vmem:[%s2795_s21 + $0x550] sm:$0xff]  ;;  %v3595_v54 = vld [vmem:[%s2795_s21 + $0x558] sm:$0xff] }
  0xad   : > { %v1579_v44 = vrot.slane %v1478_v41, 1  ;;  %v1246_v27 = vadd.f32 %v1214_v7, %v769_v46  ;;  %v473_v17 = vmul.f32 %v3467_v10, %v2805_v14  ;;  %v508_v45 = vmul.f32 %v3470_v49, %v2815_v21  ;;  %v2223_v49 = vld [vmem:[%s2795_s21 + $0x528] sm:$0xff] }
  0xae   : > { %v509_v50 = vmul.f32 %v3474_v53, %v2815_v21  ;;  %v1247_v11 = vadd.f32 %v1215_v5, %v770_v3  ;;  %v1578_v55 = vsel %vm646_vm1, %v1576_v43, %v1577_v36  ;;  %v589_v1 = vmul.f32 %v2817_v22, %v436_v0 }
  0xaf   : > { %v1580_v26 = vsel %vm646_vm1, %v1577_v36, %v1579_v44  ;;  %v1666_v32 = vadd.f32 %v1578_v55, %v1437_v33  ;;  %v540_v61 = vadd.f32 %v508_v45, %v472_v35  ;;  %v590_v53 = vmul.f32 %v3467_v10, %v2817_v22  ;;  %v2346_v33 = vld [vmem:[%s2795_s21 + $0x540] sm:$0xfe]  ;;  %v2347_v36 = vld [vmem:[%s2795_s21 + $0x560] sm:$0x1] }
  0xb0   : > { %v1667_v31 = vadd.f32 %v1580_v26, %v1438_v37  ;;  %v541_v38 = vadd.f32 %v509_v50, %v473_v17  ;;  %v591_v46 = vmul.f32 %v2817_v22, %v437_v29  ;;  %v712_v47 = vrot.slane %v589_v1, 1 }
  0xb1   : > { %v918_v18 = vmul.f32 %v2190_v52, %v2826_v28  ;;  %v1696_v19 = vadd.f32 %v1666_v32, %v1246_v27  ;;  %v919_v63 = vmul.f32 %v2191_v58, %v2826_v28  ;;  %v954_v42 = vmul.f32 %v2222_v59, %v2843_v40  ;;  %v422_v59 = vld [vmem:[%s2795_s21 + $0x240] sm:$0xfe] }
  0xb2   : > { %v1697_v48 = vadd.f32 %v1667_v31, %v1247_v11  ;;  %v713_v20 = vrot.slane %v590_v53, 1  ;;  %v715_v3 = vrot.slane %v591_v46, 1  ;;  %v955_v10 = vmul.f32 %v2223_v49, %v2843_v40 }
  0xb3   : > { %v1035_v24 = vmul.f32 %v2254_v6, %v2858_v51  ;;  %v986_v4 = vadd.f32 %v954_v42, %v918_v18  ;;  %v1036_v15 = vmul.f32 %v2191_v58, %v2858_v51  ;;  %v1037_v13 = vmul.f32 %v2255_v39, %v2858_v51  ;;  %v2176_v39 = vld [vmem:[%s2795_s21 + $0x270] sm:$0xff] }
  0xb4   : > { %v1721_v25 = vpack.c.bf16 %v1697_v48, %v1696_v19  ;;  %v714_v41 = vsel %vm646_vm1, %v712_v47, %v713_v20  ;;  %v716_v35 = vsel %vm646_vm1, %v713_v20, %v715_v3  ;;  %v987_v60 = vadd.f32 %v955_v10, %v919_v63 }
  0xb5   : > { %v1157_v7 = vrot.slane %v1035_v24, 1  ;;  %v785_v37 = vadd.f32 %v714_v41, %v540_v61  ;;  %v786_v0 = vadd.f32 %v716_v35, %v541_v38  ;;  %v1158_v5 = vrot.slane %v1036_v15, 1  ;;  %v423_v38 = vld [vmem:[%s2795_s21 + $0x260] sm:$0x1]  ;;  %v2208_v24 = vld [vmem:[%s2795_s21 + $0x278] sm:$0xff] }
  0xb6   : > { %2438 = vmatmul.mubr.bf16.gmra.mxu0 %v1721_v25  ;;  %v1160_v43 = vrot.slane %v1037_v13, 1  ;;  %v1389_v44 = vmul.f32 %v3584_v12, %v2868_v56  ;;  %v1390_v27 = vmul.f32 %v3589_v23, %v2868_v56  ;;  %v1423_v29 = vmul.f32 %v3592_v34, %v2870_v57  ;;  %v2240_v25 = vld [vmem:[%s2795_s21 + $0x270] sm:$0xfe] }
  0xb7   : > { %v1424_v17 = vmul.f32 %v3595_v54, %v2870_v57  ;;  %2441 = vmatprep.mubr.msk.bf16.mxu0 %vm2664_vm0, %v2663_v2  ;;  %v1159_v45 = vsel %vm646_vm1, %v1157_v7, %v1158_v5  ;;  %v1500_v52 = vmul.f32 %v3367_v30, %v2346_v33  ;;  %v1501_v11 = vmul.f32 %v3367_v30, %v3589_v23 }
  0xb8   : > { %v1161_v50 = vsel %vm646_vm1, %v1158_v5, %v1160_v43  ;;  %v1230_v55 = vadd.f32 %v1159_v45, %v986_v4  ;;  %v1453_v1 = vadd.f32 %v1423_v29, %v1389_v44  ;;  %v1502_v32 = vmul.f32 %v3367_v30, %v2347_v36  ;;  %v3645_v43 = vld [vmem:[%s2795_s21 + $0x2a0] sm:$0xff]  ;;  %v3654_v45 = vld [vmem:[%s2795_s21 + $0x2a8] sm:$0xff] }
  0xb9   : > { %v1231_v26 = vadd.f32 %v1161_v50, %v987_v60  ;;  %v1454_v58 = vadd.f32 %v1424_v17, %v1390_v27  ;;  %v1616_v31 = vrot.slane %v1500_v52, 1  ;;  %v1617_v61 = vrot.slane %v1501_v11, 1  ;;  %v3651_v17 = vld [vmem:[%s2795_s21 + $0x2b0] sm:$0xff]  ;;  %v3657_v50 = vld [vmem:[%s2795_s21 + $0x2b8] sm:$0xff] }
  0xba   : > { %v458_v49 = vmul.f32 %v3524_v8, %v2805_v14  ;;  %v1262_v6 = vadd.f32 %v1230_v55, %v785_v37  ;;  %v459_v46 = vmul.f32 %v3527_v9, %v2805_v14  ;;  %v494_v47 = vmul.f32 %v3531_v16, %v2815_v21  ;;  %v2177_v8 = vld [vmem:[%s2795_s21 + $0x280] sm:$0xff]  ;;  %v2209_v16 = vld [vmem:[%s2795_s21 + $0x288] sm:$0xff] }
  0xbb   : > { %v1263_v53 = vadd.f32 %v1231_v26, %v786_v0  ;;  %v1618_v18 = vsel %vm646_vm1, %v1616_v31, %v1617_v61  ;;  %v1619_v19 = vrot.slane %v1502_v32, 1  ;;  %v495_v48 = vmul.f32 %v3534_v62, %v2815_v21 }
  0xbc   : > { %v568_v63 = vmul.f32 %v2817_v22, %v422_v59  ;;  %v1682_v42 = vadd.f32 %v1618_v18, %v1453_v1  ;;  %v526_v20 = vadd.f32 %v494_v47, %v458_v49  ;;  %v569_v3 = vmul.f32 %v3527_v9, %v2817_v22  ;;  %v2241_v9 = vld [vmem:[%s2795_s21 + $0x290] sm:$0x1]  ;;  %v2332_v1 = vld [vmem:[%s2795_s21 + $0x2a0] sm:$0xfe] }
  0xbd   : > { %v570_v10 = vmul.f32 %v2817_v22, %v423_v38  ;;  %v1620_v4 = vsel %vm646_vm1, %v1617_v61, %v1619_v19  ;;  %v527_v15 = vadd.f32 %v495_v48, %v459_v46  ;;  %v904_v62 = vmul.f32 %v2176_v39, %v2826_v28  ;;  %v2333_v61 = vld [vmem:[%s2795_s21 + $0x2c0] sm:$0x1] }
  0xbe   : > { %v677_v13 = vrot.slane %v568_v63, 1  ;;  %v1683_v41 = vadd.f32 %v1620_v4, %v1454_v58  ;;  %v1712_v35 = vadd.f32 %v1682_v42, %v1262_v6  ;;  %v678_v60 = vrot.slane %v569_v3, 1  ;;  %v438_v42 = vld [vmem:[%s2795_s21 + $0x540] sm:$0xfe] }
  0xbf   : > { %v680_v7 = vrot.slane %v570_v10, 1  ;;  %v905_v33 = vmul.f32 %v2177_v8, %v2826_v28  ;;  %v940_v37 = vmul.f32 %v2208_v24, %v2843_v40  ;;  %v941_v0 = vmul.f32 %v2209_v16, %v2843_v40 }
  0xc0   : > { %v1014_v5 = vmul.f32 %v2240_v25, %v2858_v51  ;;  %v1713_v36 = vadd.f32 %v1683_v41, %v1263_v53  ;;  %v679_v44 = vsel %vm646_vm1, %v677_v13, %v678_v60  ;;  %v1015_v29 = vmul.f32 %v2177_v8, %v2858_v51 }
  0xc1   : > { %v681_v27 = vsel %vm646_vm1, %v678_v60, %v680_v7  ;;  %v771_v52 = vadd.f32 %v679_v44, %v526_v20  ;;  %v972_v55 = vadd.f32 %v940_v37, %v904_v62  ;;  %v973_v26 = vadd.f32 %v941_v0, %v905_v33  ;;  %v2192_v60 = vld [vmem:[%s2795_s21 + $0x570] sm:$0xff]  ;;  %v2193_v0 = vld [vmem:[%s2795_s21 + $0x580] sm:$0xff] }
  0xc2   : > { %v772_v11 = vadd.f32 %v681_v27, %v527_v15  ;;  %v1729_v58 = vpack.c.bf16 %v1713_v36, %v1712_v35  ;;  %v1016_v59 = vmul.f32 %v2241_v9, %v2858_v51  ;;  %v1122_v32 = vrot.slane %v1014_v5, 1  ;;  %v439_v15 = vld [vmem:[%s2795_s21 + $0x560] sm:$0x1]  ;;  %v2224_v5 = vld [vmem:[%s2795_s21 + $0x578] sm:$0xff] }
  0xc3   : > { %v1123_v31 = vrot.slane %v1015_v29, 1  ;;  %v1375_v38 = vmul.f32 %v3645_v43, %v2868_v56  ;;  %v1376_v49 = vmul.f32 %v3651_v17, %v2868_v56  ;;  %v1409_v6 = vmul.f32 %v3654_v45, %v2870_v57  ;;  %v2256_v29 = vld [vmem:[%s2795_s21 + $0x570] sm:$0xfe] }
  0xc4   : > { %v1410_v53 = vmul.f32 %v3657_v50, %v2870_v57  ;;  %2470 = vmatmul.mubr.bf16.gmra.mxu1 %v1729_v58  ;;  %v1125_v47 = vrot.slane %v1016_v59, 1  ;;  %v1479_v39 = vmul.f32 %v3367_v30, %v2332_v1  ;;  %v1480_v18 = vmul.f32 %v3367_v30, %v3651_v17  ;;  %v2257_v58 = vld [vmem:[%s2795_s21 + $0x590] sm:$0x1] }
  0xc5   : > { %v1124_v46 = vsel %vm646_vm1, %v1122_v32, %v1123_v31  ;;  %2473 = vmatprep.mubr.msk.bf16.mxu1 %vm2664_vm0, %v2663_v2  ;;  %v1439_v48 = vadd.f32 %v1409_v6, %v1375_v38  ;;  %v1481_v8 = vmul.f32 %v3367_v30, %v2333_v61  ;;  %v474_v24 = vmul.f32 %v3584_v12, %v2805_v14  ;;  %v3708_v6 = vld [vmem:[%s2795_s21 + $0x5a0] sm:$0xff] }
  0xc6   : > { %v1216_v19 = vadd.f32 %v1124_v46, %v972_v55  ;;  %v1440_v63 = vadd.f32 %v1410_v53, %v1376_v49  ;;  %v1126_v20 = vsel %vm646_vm1, %v1123_v31, %v1125_v47  ;;  %v1581_v3 = vrot.slane %v1479_v39, 1  ;;  %v3711_v53 = vld [vmem:[%s2795_s21 + $0x5b0] sm:$0xff]  ;;  %v3714_v46 = vld [vmem:[%s2795_s21 + $0x5a8] sm:$0xff] }
  0xc7   : > { %v1582_v10 = vrot.slane %v1480_v18, 1  ;;  %v1217_v16 = vadd.f32 %v1126_v20, %v973_v26  ;;  %v1584_v4 = vrot.slane %v1481_v8, 1  ;;  %v475_v13 = vmul.f32 %v3589_v23, %v2805_v14 }
  0xc8   : > { %v1248_v25 = vadd.f32 %v1216_v19, %v771_v52  ;;  %v510_v41 = vmul.f32 %v3592_v34, %v2815_v21  ;;  %v511_v35 = vmul.f32 %v3595_v54, %v2815_v21  ;;  %v592_v12 = vmul.f32 %v2817_v22, %v438_v42  ;;  %v2225_v54 = vld [vmem:[%s2795_s21 + $0x588] sm:$0xff] }
  0xc9   : > { %v1583_v62 = vsel %vm646_vm1, %v1581_v3, %v1582_v10  ;;  %v1249_v7 = vadd.f32 %v1217_v16, %v772_v11  ;;  %v1585_v9 = vsel %vm646_vm1, %v1582_v10, %v1584_v4  ;;  %v593_v37 = vmul.f32 %v3589_v23, %v2817_v22  ;;  %v2349_v10 = vld [vmem:[%s2795_s21 + $0x5c0] sm:$0x1] }
  0xca   : > { %v1668_v33 = vadd.f32 %v1583_v62, %v1439_v48  ;;  %v1669_v36 = vadd.f32 %v1585_v9, %v1440_v63  ;;  %v542_v44 = vadd.f32 %v510_v41, %v474_v24  ;;  %v543_v27 = vadd.f32 %v511_v35, %v475_v13  ;;  %v3718_v48 = vld [vmem:[%s2795_s21 + $0x5b8] sm:$0xff]  ;;  %v2348_v63 = vld [vmem:[%s2795_s21 + $0x5a0] sm:$0xfe] }
  0xcb   : > { %v594_v34 = vmul.f32 %v2817_v22, %v439_v15  ;;  %v717_v11 = vrot.slane %v592_v12, 1  ;;  %v718_v55 = vrot.slane %v593_v37, 1  ;;  %v920_v26 = vmul.f32 %v2192_v60, %v2826_v28 }
  0xcc   : > { %v1698_v52 = vadd.f32 %v1668_v33, %v1248_v25  ;;  %v1699_v1 = vadd.f32 %v1669_v36, %v1249_v7  ;;  %v921_v59 = vmul.f32 %v2193_v0, %v2826_v28  ;;  %v956_v32 = vmul.f32 %v2224_v5, %v2843_v40  ;;  %v424_v7 = vld [vmem:[%s2795_s21 + $0x2a0] sm:$0xfe] }
  0xcd   : > { %v720_v23 = vrot.slane %v594_v34, 1  ;;  %v719_v31 = vsel %vm646_vm1, %v717_v11, %v718_v55  ;;  %v957_v61 = vmul.f32 %v2225_v54, %v2843_v40  ;;  %v1038_v38 = vmul.f32 %v2256_v29, %v2858_v51  ;;  %v425_v29 = vld [vmem:[%s2795_s21 + $0x2c0] sm:$0x1] }
  0xce   : > { %v1039_v49 = vmul.f32 %v2193_v0, %v2858_v51  ;;  %v1722_v47 = vpack.c.bf16 %v1699_v1, %v1698_v52  ;;  %v787_v18 = vadd.f32 %v719_v31, %v542_v44  ;;  %v988_v19 = vadd.f32 %v956_v32, %v920_v26  ;;  %v2210_v32 = vld [vmem:[%s2795_s21 + $0x2d8] sm:$0xff] }
  0xcf   : > { %v721_v39 = vsel %vm646_vm1, %v718_v55, %v720_v23  ;;  %v989_v42 = vadd.f32 %v957_v61, %v921_v59  ;;  %v1040_v20 = vmul.f32 %v2257_v58, %v2858_v51  ;;  %v1162_v3 = vrot.slane %v1038_v38, 1  ;;  %v2178_v55 = vld [vmem:[%s2795_s21 + $0x2d0] sm:$0xff]  ;;  %v2179_v59 = vld [vmem:[%s2795_s21 + $0x2e0] sm:$0xff] }
  0xd0   : > { %v788_v8 = vadd.f32 %v721_v39, %v543_v27  ;;  %2442 = vmatmul.mubr.bf16.gmra.mxu0 %v1722_v47  ;;  %v1163_v24 = vrot.slane %v1039_v49, 1  ;;  %v1391_v16 = vmul.f32 %v3708_v6, %v2868_v56  ;;  %v1392_v25 = vmul.f32 %v3711_v53, %v2868_v56  ;;  %v2242_v49 = vld [vmem:[%s2795_s21 + $0x2d0] sm:$0xfe] }
  0xd1   : > { %v1425_v4 = vmul.f32 %v3714_v46, %v2870_v57  ;;  %v1165_v15 = vrot.slane %v1040_v20, 1  ;;  %v1426_v13 = vmul.f32 %v3718_v48, %v2870_v57  ;;  %v1503_v62 = vmul.f32 %v3367_v30, %v2348_v63  ;;  %2445 = vmatprep.mubr.msk.bf16.mxu0 %vm2664_vm0, %v2663_v2 }
  0xd2   : > { %v1504_v41 = vmul.f32 %v3367_v30, %v3711_v53  ;;  %v1164_v35 = vsel %vm646_vm1, %v1162_v3, %v1163_v24  ;;  %v1505_v60 = vmul.f32 %v3367_v30, %v2349_v10  ;;  %v460_v9 = vmul.f32 %v3645_v43, %v2805_v14 }
  0xd3   : > { %v1455_v12 = vadd.f32 %v1425_v4, %v1391_v16  ;;  %v1166_v33 = vsel %vm646_vm1, %v1163_v24, %v1165_v15  ;;  %v1232_v37 = vadd.f32 %v1164_v35, %v988_v19  ;;  %v1456_v0 = vadd.f32 %v1426_v13, %v1392_v25  ;;  %v2274_v25 = vld [vmem:[%s2795_s21 + $0x300] sm:$0xff]  ;;  %v2275_v4 = vld [vmem:[%s2795_s21 + $0x310] sm:$0xff]  ;;  %v2304_v35 = vld [vmem:[%s2795_s21 + $0x308] sm:$0xff] }
  0xd4   : > { %v1621_v5 = vrot.slane %v1503_v62, 1  ;;  %v1233_v36 = vadd.f32 %v1166_v33, %v989_v42  ;;  %v1622_v44 = vrot.slane %v1504_v41, 1  ;;  %v1624_v27 = vrot.slane %v1505_v60, 1  ;;  %v2334_v60 = vld [vmem:[%s2795_s21 + $0x300] sm:$0xfe] }
  0xd5   : > { %v461_v34 = vmul.f32 %v3651_v17, %v2805_v14  ;;  %v1264_v54 = vadd.f32 %v1232_v37, %v787_v18  ;;  %v496_v43 = vmul.f32 %v3654_v45, %v2815_v21  ;;  %v497_v52 = vmul.f32 %v3657_v50, %v2815_v21  ;;  %v2211_v50 = vld [vmem:[%s2795_s21 + $0x2e8] sm:$0xff] }
  0xd6   : > { %v571_v11 = vmul.f32 %v2817_v22, %v424_v7  ;;  %v1265_v26 = vadd.f32 %v1233_v36, %v788_v8  ;;  %v1623_v1 = vsel %vm646_vm1, %v1621_v5, %v1622_v44  ;;  %v1625_v23 = vsel %vm646_vm1, %v1622_v44, %v1624_v27  ;;  %v2243_v8 = vld [vmem:[%s2795_s21 + $0x2f0] sm:$0x1] }
  0xd7   : > { %v572_v58 = vmul.f32 %v3651_v17, %v2817_v22  ;;  %v1684_v31 = vadd.f32 %v1623_v1, %v1455_v12  ;;  %v1685_v61 = vadd.f32 %v1625_v23, %v1456_v0  ;;  %v528_v45 = vadd.f32 %v496_v43, %v460_v9  ;;  %v2305_v12 = vld [vmem:[%s2795_s21 + $0x318] sm:$0xff]  ;;  %v2335_v0 = vld [vmem:[%s2795_s21 + $0x320] sm:$0x1] }
  0xd8   : > { %v529_v38 = vadd.f32 %v497_v52, %v461_v34  ;;  %v573_v47 = vmul.f32 %v2817_v22, %v425_v29  ;;  %v682_v39 = vrot.slane %v571_v11, 1  ;;  %v906_v19 = vmul.f32 %v2178_v55, %v2826_v28 }
  0xd9   : > { %v683_v18 = vrot.slane %v572_v58, 1  ;;  %v1714_v63 = vadd.f32 %v1684_v31, %v1264_v54  ;;  %v1715_v17 = vadd.f32 %v1685_v61, %v1265_v26  ;;  %v907_v42 = vmul.f32 %v2179_v59, %v2826_v28 }
  0xda   : > { %v942_v20 = vmul.f32 %v2210_v32, %v2843_v40  ;;  %v685_v10 = vrot.slane %v573_v47, 1  ;;  %v943_v24 = vmul.f32 %v2211_v50, %v2843_v40  ;;  %v1017_v16 = vmul.f32 %v2242_v49, %v2858_v51  ;;  %v2194_v49 = vld [vmem:[%s2795_s21 + $0x5d0] sm:$0xff] }
  0xdb   : > { %v684_v3 = vsel %vm646_vm1, %v682_v39, %v683_v18  ;;  %v1730_v15 = vpack.c.bf16 %v1715_v17, %v1714_v63  ;;  %v1018_v41 = vmul.f32 %v2179_v59, %v2858_v51  ;;  %v1019_v33 = vmul.f32 %v2243_v8, %v2858_v51  ;;  %v440_v59 = vld [vmem:[%s2795_s21 + $0x5a0] sm:$0xfe]  ;;  %v2226_v17 = vld [vmem:[%s2795_s21 + $0x5d8] sm:$0xff] }
  0xdc   : > { %v773_v13 = vadd.f32 %v684_v3, %v528_v45  ;;  %v974_v62 = vadd.f32 %v942_v20, %v906_v19  ;;  %v686_v7 = vsel %vm646_vm1, %v683_v18, %v685_v10  ;;  %v975_v9 = vadd.f32 %v943_v24, %v907_v42  ;;  %v2195_v63 = vld [vmem:[%s2795_s21 + $0x5e0] sm:$0xff]  ;;  %v2227_v20 = vld [vmem:[%s2795_s21 + $0x5e8] sm:$0xff]  ;;  %v2258_v3 = vld [vmem:[%s2795_s21 + $0x5d0] sm:$0xfe] }
  0xdd   : > { %v1127_v37 = vrot.slane %v1017_v16, 1  ;;  %2474 = vmatmul.mubr.bf16.gmra.mxu1 %v1730_v15  ;;  %v774_v5 = vadd.f32 %v686_v7, %v529_v38  ;;  %v1128_v36 = vrot.slane %v1018_v41, 1  ;;  %v1377_v44 = vmul.f32 %v2274_v25, %v2868_v56  ;;  %v2259_v25 = vld [vmem:[%s2795_s21 + $0x5f0] sm:$0x1] }
  0xde   : > { %v1378_v27 = vmul.f32 %v2275_v4, %v2868_v56  ;;  %2493 = vmatprep.mubr.msk.bf16.mxu1 %vm2664_vm0, %v2663_v2  ;;  %v1130_v34 = vrot.slane %v1019_v33, 1  ;;  %v1411_v54 = vmul.f32 %v2304_v35, %v2870_v57  ;;  %v1412_v29 = vmul.f32 %v2305_v12, %v2870_v57  ;;  %v1963_v35 = vld [vmem:[%s3806_s26 + $0x10] sm:$0xff]  ;;  %v1962_v33 = vld [vmem:[%s3806_s26] sm:$0xff] }
  0xdf   : > { %v1482_v43 = vmul.f32 %v3367_v30, %v2334_v60  ;;  %v1129_v52 = vsel %vm646_vm1, %v1127_v37, %v1128_v36  ;;  %v1483_v11 = vmul.f32 %v3367_v30, %v2275_v4  ;;  %v1484_v55 = vmul.f32 %v3367_v30, %v2335_v0  ;;  %v441_v30 = vld [vmem:[%s2795_s21 + $0x5c0] sm:$0x1]  ;;  %v1965_v37 = vld [vmem:[%s3806_s26 + $0x18] sm:$0xff]  ;;  %s281_s21 = sand.u32 1, %s2645_s16  }
  0xe0   : > { %v476_v26 = vmul.f32 %v3708_v6, %v2805_v14  ;;  %v1131_v2 = vsel %vm646_vm1, %v1128_v36, %v1130_v34  ;;  %v1218_v1 = vadd.f32 %v1129_v52, %v974_v62  ;;  %v1441_v23 = vadd.f32 %v1411_v54, %v1377_v44  ;;  %s2161_s5 = sshll.u32 %s281_s21, 8  ;;  %s3890_s14 = scalar_lea.sflag [#allocation3], %s281_s21 }
  0xe1   : > { %v1442_v58 = vadd.f32 %v1412_v29, %v1378_v27  ;;  %v1219_v32 = vadd.f32 %v1131_v2, %v975_v9  ;;  %v1586_v31 = vrot.slane %v1482_v43, 1  ;;  %v1587_v61 = vrot.slane %v1483_v11, 1  ;;  %v1966_v27 = vld [vmem:[%s3806_s26] sm:$0xfe]  ;;  %v1967_v43 = vld [vmem:[%s3806_s26 + $0x20] sm:$0x1] }
  0xe2   : > { %v1589_v45 = vrot.slane %v1484_v55, 1  ;;  %v1250_v38 = vadd.f32 %v1218_v1, %v773_v13  ;;  %v477_v6 = vmul.f32 %v3711_v53, %v2805_v14  ;;  %v512_v50 = vmul.f32 %v3714_v46, %v2815_v21  ;;  %v2584_v1 = vld [vmem:[%s3937_s2 + $0x8] ss:$0 sm:$0xff]  ;;  %s3845_s6 = scalar_lea.vmem [#allocation2], %s2161_s5 }
  0xe3   : > { %v1251_v47 = vadd.f32 %v1219_v32, %v774_v5  ;;  %v1588_v39 = vsel %vm646_vm1, %v1586_v31, %v1587_v61  ;;  %v595_v19 = vmul.f32 %v2817_v22, %v440_v59  ;;  %v513_v14 = vmul.f32 %v3718_v48, %v2815_v21  ;;  %s2053_s9 = sshll.u32 %s3845_s6, 4  ;;  %s3885_s9 = int_to_ptr.vmem [resolvable:$true] %s2053_s9 }
  0xe4   : > { %v1590_v18 = vsel %vm646_vm1, %v1587_v61, %v1589_v45  ;;  %v1670_v8 = vadd.f32 %v1588_v39, %v1441_v23  ;;  %v544_v46 = vadd.f32 %v512_v50, %v476_v26  ;;  %v596_v10 = vmul.f32 %v3711_v53, %v2817_v22  ;;  %s2585_s18 = scalar_lea.vmem %s3885_s9, 4096  ;;  %p2592_p1 = scmp.lt.s32.totalorder %s3885_s9, %s2590_s24 }
  0xe5   : > { %v1671_v42 = vadd.f32 %v1590_v18, %v1442_v58  ;;  %v597_v24 = vmul.f32 %v2817_v22, %v441_v30  ;;  %v722_v16 = vrot.slane %v595_v19, 1  ;;  %v922_v4 = vmul.f32 %v2194_v49, %v2826_v28  ;;  %p2586_p12 = scmp.ne.s32.totalorder %s3885_s9, %s2585_s18  ;;  %p2593_p2 = scmp.lt.s32.totalorder %s2591_s7, %s2585_s18 }
  0xe6   : > { %v1700_v15 = vadd.f32 %v1670_v8, %v1250_v38  ;;  %v923_v21 = vmul.f32 %v2195_v63, %v2826_v28  ;;  %v958_v48 = vmul.f32 %v2226_v17, %v2843_v40  ;;  %v723_v62 = vrot.slane %v596_v10, 1  ;;  %v1964_v28 = vld [vmem:[%s3806_s26 + $0x8] sm:$0xff] }
  0xe7   : > { %v1701_v13 = vadd.f32 %v1671_v42, %v1251_v47  ;;  %v725_v41 = vrot.slane %v597_v24, 1  ;;  %v959_v53 = vmul.f32 %v2227_v20, %v2843_v40  ;;  %v1041_v22 = vmul.f32 %v2258_v3, %v2858_v51  ;;  %p2587_p13 = pnand %p2586_p12, %p2733_p4  ;;  %p2594_p3 = por %p2593_p2, %p2592_p1 }
  0xe8   : > { %v545_v60 = vadd.f32 %v513_v14, %v477_v6  ;;  %v1042_v7 = vmul.f32 %v2195_v63, %v2858_v51  ;;  %v1043_v9 = vmul.f32 %v2259_v25, %v2858_v51  ;;  %v724_v0 = vsel %vm646_vm1, %v722_v16, %v723_v62 }
  0xe9   : > { %v1723_v12 = vpack.c.bf16 %v1701_v13, %v1700_v15  ;;  %v990_v5 = vadd.f32 %v958_v48, %v922_v4  ;;  %v991_v36 = vadd.f32 %v959_v53, %v923_v21  ;;  %v1167_v44 = vrot.slane %v1041_v22, 1  ;;  %p2588_p0 = pneg %p2587_p13 }
  0xea   : > { %v726_v40 = vsel %vm646_vm1, %v723_v62, %v725_v41  ;;  %v789_v34 = vadd.f32 %v724_v0, %v544_v46  ;;  %v1168_v54 = vrot.slane %v1042_v7, 1  ;;  %v1170_v29 = vrot.slane %v1043_v9, 1 }
  0xeb   : > { %2446 = vmatmul.mubr.bf16.gmra.mxu0 %v1723_v12  ;;  %v1968_v51 = vmul.f32 %v1962_v33, %v2868_v56  ;;  %v1969_v52 = vmul.f32 %v1963_v35, %v2868_v56  ;;  %v1970_v11 = vmul.f32 %v1964_v28, %v2870_v57  ;;  %v1971_v55 = vmul.f32 %v1965_v37, %v2870_v57  ;;  %p2595_p5 = pnand %p2594_p3, %p2588_p0 }
  0xec   : > { %v1169_v26 = vsel %vm646_vm1, %v1167_v44, %v1168_v54  ;;  %v1171_v2 = vsel %vm646_vm1, %v1168_v54, %v1170_v29  ;;  %v1974_v23 = vmul.f32 %v2584_v1, %v1966_v27  ;;  %v1975_v58 = vmul.f32 %v2584_v1, %v1963_v35 }
  0xed   : > { %v790_v59 = vadd.f32 %v726_v40, %v545_v60  ;;  %v1234_v32 = vadd.f32 %v1169_v26, %v990_v5  ;;  %v1235_v31 = vadd.f32 %v1171_v2, %v991_v36  ;;  %v1972_v56 = vadd.f32 %v1970_v11, %v1968_v51 }
  0xee   : > { %v1976_v61 = vmul.f32 %v2584_v1, %v1967_v43  ;;  %v1980_v45 = vrot.slane %v1974_v23, 1  ;;  %v1981_v38 = vrot.slane %v1975_v58, 1  ;;  %v1973_v30 = vadd.f32 %v1971_v55, %v1969_v52 }
  0xef   : > { %v1266_v57 = vadd.f32 %v1234_v32, %v789_v34  ;;  %v1267_v49 = vadd.f32 %v1235_v31, %v790_v59 }
  0xf0   : > { %v1982_v6 = vsel %vm646_vm1, %v1980_v45, %v1981_v38  ;;  %v1983_v50 = vrot.slane %v1976_v61, 1 }
  0xf1   : > { %v1987_v47 = vadd.f32 %v1982_v6, %v1972_v56 }
  0xf2   : > { %v1984_v18 = vsel %vm646_vm1, %v1981_v38, %v1983_v50 }
  0xf3   : > { %v1988_v19 = vadd.f32 %v1984_v18, %v1973_v30  ;;  %v1989_v63 = vadd.f32 %v1987_v47, %v1266_v57 }
  0xf5   : > { %v1813_v39 = vpop.f32.mrf.mxu0  ;;  %v1990_v8 = vadd.f32 %v1988_v19, %v1267_v49 }
  0xf6   : > { %1932 = vst [vmem:[%s3845_s6] sm:$0xff] %v1813_v39 }
  0xf7   : > { %v2419_v17 = vpop.f32.mrf.mxu0  ;;  %v1991_v14 = vpack.c.bf16 %v1990_v8, %v1989_v63 }
  0xf9   : > { %v1816_v42 = vpop.f32.mrf.mxu0  ;;  %2494 = vmatmul.mubr.bf16.vlgmr.msra.gmra.mxu1 %v1991_v14 }
  0xfa   : > { %1933 = vst [vmem:[%s3845_s6 + $0x8] sm:$0xff] %v1816_v42 }
  0xfb   : > { %v2420_v46 = vpop.f32.mrf.mxu0 }
  0xfe   : > { %v1877_v20 = vpop.f32.mrf.mxu1 }
  0xff   : > { %1948 = vst [vmem:[%s3845_s6 + $0x80] sm:$0xff] %v1877_v20 }
 0x100   : > { %v2451_v3 = vpop.f32.mrf.mxu1 }
 0x102   : > { %v1880_v10 = vpop.f32.mrf.mxu1 }
 0x103   : > { %1949 = vst [vmem:[%s3845_s6 + $0x88] sm:$0xff] %v1880_v10 }
 0x104   : > { %v2452_v24 = vpop.f32.mrf.mxu1 }
 0x10c   : > { %v1821_v16 = vpop.f32.mrf.mxu0 }
 0x10d   : > { %1934 = vst [vmem:[%s3845_s6 + $0x10] sm:$0xff] %v1821_v16 }
 0x10e   : > { %v2423_v25 = vpop.f32.mrf.mxu0 }
 0x110   : > { %v1824_v4 = vpop.f32.mrf.mxu0 }
 0x111   : > { %1935 = vst [vmem:[%s3845_s6 + $0x18] sm:$0xff] %v1824_v4 }
 0x112   : > { %v2424_v15 = vpop.f32.mrf.mxu0 }
 0x11a   : > { %v1885_v13 = vpop.f32.mrf.mxu1 }
 0x11b   : > { %1950 = vst [vmem:[%s3845_s6 + $0x90] sm:$0xff] %v1885_v13 }
 0x11c   : > { %v2455_v21 = vpop.f32.mrf.mxu1 }
 0x11e   : > { %v1888_v48 = vpop.f32.mrf.mxu1 }
 0x11f   : > { %1951 = vst [vmem:[%s3845_s6 + $0x98] sm:$0xff] %v1888_v48 }
 0x120   : > { %v2456_v62 = vpop.f32.mrf.mxu1 }
 0x126   : > { %v1829_v41 = vpop.f32.mrf.mxu0 }
 0x127   : > { %1936 = vst [vmem:[%s3845_s6 + $0x20] sm:$0xff] %v1829_v41 }
 0x128   : > { %v2427_v53 = vpop.f32.mrf.mxu0 }
 0x12a   : > { %v1832_v22 = vpop.f32.mrf.mxu0 }
 0x12b   : > { %1937 = vst [vmem:[%s3845_s6 + $0x28] sm:$0xff] %v1832_v22 }
 0x12c   : > { %v2428_v35 = vpop.f32.mrf.mxu0 }
 0x133   : > { %v1893_v12 = vpop.f32.mrf.mxu1 }
 0x134   : > { %1952 = vst [vmem:[%s3845_s6 + $0xa0] sm:$0xff] %v1893_v12 }
 0x135   : > { %v2459_v60 = vpop.f32.mrf.mxu1 }
 0x137   : > { %v1896_v7 = vpop.f32.mrf.mxu1 }
 0x138   : > { %1953 = vst [vmem:[%s3845_s6 + $0xa8] sm:$0xff] %v1896_v7 }
 0x139   : > { %v2460_v9 = vpop.f32.mrf.mxu1 }
 0x141   : > { %v1837_v33 = vpop.f32.mrf.mxu0 }
 0x142   : > { %1938 = vst [vmem:[%s3845_s6 + $0x30] sm:$0xff] %v1837_v33 }
 0x143   : > { %v2431_v28 = vpop.f32.mrf.mxu0 }
 0x145   : > { %v1840_v37 = vpop.f32.mrf.mxu0 }
 0x146   : > { %1939 = vst [vmem:[%s3845_s6 + $0x38] sm:$0xff] %v1840_v37 }
 0x147   : > { %v2432_v0 = vpop.f32.mrf.mxu0 }
 0x14f   : > { %v1901_v5 = vpop.f32.mrf.mxu1 }
 0x150   : > { %1954 = vst [vmem:[%s3845_s6 + $0xb0] sm:$0xff] %v1901_v5 }
 0x151   : > { %v2463_v36 = vpop.f32.mrf.mxu1 }
 0x153   : > { %v1904_v44 = vpop.f32.mrf.mxu1 }
 0x154   : > { %1955 = vst [vmem:[%s3845_s6 + $0xb8] sm:$0xff] %v1904_v44 }
 0x155   : > { %v2464_v27 = vpop.f32.mrf.mxu1 }
 0x15b   : > { %v1845_v40 = vpop.f32.mrf.mxu0 }
 0x15c   : > { %1940 = vst [vmem:[%s3845_s6 + $0x40] sm:$0xff] %v1845_v40 }
 0x15d   : > { %v2435_v34 = vpop.f32.mrf.mxu0 }
 0x15f   : > { %v1848_v54 = vpop.f32.mrf.mxu0 }
 0x160   : > { %1941 = vst [vmem:[%s3845_s6 + $0x48] sm:$0xff] %v1848_v54 }
 0x161   : > { %v2436_v29 = vpop.f32.mrf.mxu0 }
 0x168   : > { %v1909_v43 = vpop.f32.mrf.mxu1 }
 0x169   : > { %1956 = vst [vmem:[%s3845_s6 + $0xc0] sm:$0xff] %v1909_v43 }
 0x16a   : > { %v2467_v51 = vpop.f32.mrf.mxu1 }
 0x16c   : > { %v1912_v52 = vpop.f32.mrf.mxu1 }
 0x16d   : > { %1957 = vst [vmem:[%s3845_s6 + $0xc8] sm:$0xff] %v1912_v52 }
 0x16e   : > { %v2468_v11 = vpop.f32.mrf.mxu1 }
 0x176   : > { %v1853_v55 = vpop.f32.mrf.mxu0 }
 0x177   : > { %1942 = vst [vmem:[%s3845_s6 + $0x50] sm:$0xff] %v1853_v55 }
 0x178   : > { %v2439_v26 = vpop.f32.mrf.mxu0 }
 0x17a   : > { %v1856_v2 = vpop.f32.mrf.mxu0 }
 0x17b   : > { %1943 = vst [vmem:[%s3845_s6 + $0x58] sm:$0xff] %v1856_v2 }
 0x17c   : > { %v2440_v1 = vpop.f32.mrf.mxu0 }
 0x184   : > { %v1917_v23 = vpop.f32.mrf.mxu1 }
 0x185   : > { %1958 = vst [vmem:[%s3845_s6 + $0xd0] sm:$0xff] %v1917_v23 }
 0x186   : > { %v2471_v58 = vpop.f32.mrf.mxu1 }
 0x188   : > { %v1920_v59 = vpop.f32.mrf.mxu1 }
 0x189   : > { %1959 = vst [vmem:[%s3845_s6 + $0xd8] sm:$0xff] %v1920_v59 }
 0x18a   : > { %v2472_v32 = vpop.f32.mrf.mxu1 }
 0x190   : > { %v1861_v31 = vpop.f32.mrf.mxu0 }
 0x191   : > { %1944 = vst [vmem:[%s3845_s6 + $0x60] sm:$0xff] %v1861_v31 }
 0x192   : > { %v2443_v56 = vpop.f32.mrf.mxu0 }
 0x194   : > { %v1864_v61 = vpop.f32.mrf.mxu0 }
 0x195   : > { %1945 = vst [vmem:[%s3845_s6 + $0x68] sm:$0xff] %v1864_v61 }
 0x196   : > { %v2444_v45 = vpop.f32.mrf.mxu0 }
 0x19d   : > { %v1925_v38 = vpop.f32.mrf.mxu1 }
 0x19e   : > { %1960 = vst [vmem:[%s3845_s6 + $0xe0] sm:$0xff] %v1925_v38 }
 0x19f   : > { %v2475_v57 = vpop.f32.mrf.mxu1 }
 0x1a1   : > { %v1928_v30 = vpop.f32.mrf.mxu1 }
 0x1a2   : > { %1961 = vst [vmem:[%s3845_s6 + $0xe8] sm:$0xff] %v1928_v30 }
 0x1a3   : > { %v2476_v6 = vpop.f32.mrf.mxu1 }
 0x1ab   : > { %v1869_v50 = vpop.f32.mrf.mxu0 }
 0x1ac   : > { %1946 = vst [vmem:[%s3845_s6 + $0x70] sm:$0xff] %v1869_v50 }
 0x1ad   : > { %v2447_v49 = vpop.f32.mrf.mxu0 }
 0x1af   : > { %v1872_v47 = vpop.f32.mrf.mxu0 }
 0x1b0   : > { %1947 = vst [vmem:[%s3845_s6 + $0x78] sm:$0xff] %v1872_v47 }
 0x1b1   : > { %v2448_v39 = vpop.f32.mrf.mxu0 }
 0x1b9   : > { %v2026_v18 = vpop.f32.mrf.mxu1 }
 0x1ba   : > { %2359 = vst [vmem:[%s3845_s6 + $0xf0] sm:$0xff] %v2026_v18 }
 0x1bb   : > { %v2495_v19 = vpop.f32.mrf.mxu1 }
 0x1bd   : > { %v2029_v63 = vpop.f32.mrf.mxu1 }
 0x1be   : > { %2360 = vst [vmem:[%s3845_s6 + $0xf8] sm:$0xff] %v2029_v63 }
 0x1bf   : > { %v2496_v17 = vpop.f32.mrf.mxu1 }
 0x1c0   : > { %2598 = shalt.err (!%p2595_p5)
}
 0x1c1   : > { %s2599_s10 = scalar_lea.hbm %s3883_s13, 4096  ;;  %s2603_s29 = scalar_lea.hbm %s3939_s4, 8192 }
 0x1c2   : > { %p2600_p6 = scmp.ne.s32.totalorder %s3883_s13, %s2599_s10  ;;  %p2604_p10 = scmp.lt.s32.totalorder %s3883_s13, %s3939_s4 }
 0x1c3   : > { %p2605_p11 = scmp.lt.s32.totalorder %s2603_s29, %s2599_s10 }
 0x1c4   : > { %p2601_p7 = pnand %p2600_p6, %p2733_p4 }
 0x1c5   : > { %p2606_p12 = por %p2605_p11, %p2604_p10 }
 0x1c6   : > { %p2602_p9 = pneg %p2601_p7 }
 0x1c8   : > { %p2607_p13 = pnand %p2606_p12, %p2602_p9 }
 0x1ca   : > { %2610 = shalt.err (!%p2607_p13)
}
 0x1cb   : > { %s2666_s6 = smov 128   ;;  %s2667_s8 = smov 8  }
 0x1cc   : > { %2515 = dma.vmem_to_hbm [thread:$0]  (%p2733_p4), %s3885_s9, 4096, %s3883_s13, %s3890_s14, %s2666_s6, %s2666_s6, %s2667_s8  }
 0x1cd PF: > { %p2522_p0 = scmp.ge.s32.totalorder %s2661_s20, 2  ;;  %s2068_s11 = sand.u32 1, %s2641_s15  }
 0x1ce   : > { %s2069_s12 = scalar_lea.sflag [#allocation3], %s2068_s11 }
 0x1cf   : > { %p2518_p1 = pnand %p2522_p0, %p2740_p8 }
 0x1d1   : > { %p2519_p2 = pneg %p2518_p1 }
 0x1d3   : > { %2636 = dma.done.wait (%p2519_p2), %s2069_s12, 4096  }
 0x1d4   : > { %2638 = vsyncadd (%p2519_p2), %s2069_s12, 4294963200  ;;  %s17_s20 = sadd.s32 1, %s2661_s20   ;;  %s3942_s15 = smov %s2645_s16 }
 0x1d5   : > { %p14_p3 = scmp.ge.s32.totalorder %s17_s20, 4   ;;  %s3943_s16 = smov %s2649_s17 }
 0x1d6   : > { %s3944_s17 = smov %s2746_s28  ;;  %s3945_s18 = smov %s2657_s19 }
 0x1d7   : > { %s3946_s19 = smov %s3948_s23  ;;  %16 = sbr.rel (!%p14_p3) target bundleno = 4 (0x4), region = 77 }
 0x1dc   :  { %2074 = vsyncpa [#allocation3], 1 }
 0x1dd   :  { %2076 = vsyncpa [#allocation3 + $0x1], 1 }

</bundles_post_ra>
